<compile_context>
chip_gen: v7x
topology: tpu7x:2x2x1
jax: 0.10.0
libtpu: 0.0.40
codegen_flags: <defaults>
</compile_context>

<pallas_src>
import functools
import math

import jax
import jax.numpy as jnp
from jax.experimental import pallas as pl
from jax.experimental.pallas import tpu as pltpu


# Set to jnp.bfloat16 on v6e/v7x for the bf16 MXU path (f32 accumulation is preserved via
# preferred_element_type); f32 default keeps exact reference numerics on all generations.
MXU_DTYPE = jnp.float32

_VMEM_LIMIT = 32 * 1024 * 1024   # explicit VMEM budget: legal on v5e/v6e (128 MiB) and v7x (64 MiB)
_NEG_INF = -1e9
_LN_EPS = 1e-5


def _compiler_params():
    return pltpu.CompilerParams(
        dimension_semantics=("parallel",),
        vmem_limit_bytes=_VMEM_LIMIT,
    )


def _row_tile(m, target=512):
    # Largest multiple-of-8 tile <= target that divides m (falls back to full m).
    for cand in (target, 256, 128, 64, 32, 16, 8):
        if cand <= m and m % cand == 0:
            return cand
    return m


def _layernorm(y, gamma, beta):
    mean = jnp.mean(y, axis=-1, keepdims=True)
    var = jnp.mean(jnp.square(y - mean), axis=-1, keepdims=True)
    return (y - mean) * jax.lax.rsqrt(var + _LN_EPS) * gamma + beta


# ----------------------------------------------------------------------------
# Kernel 1: encoder front-end  (input projection + LayerNorm + positional add)
# ----------------------------------------------------------------------------

def _input_block_kernel(x_ref, w_ref, b_ref, g_ref, beta_ref, pos_ref, o_ref):
    x = x_ref[0]                                          # (T, F)
    h = jnp.dot(x.astype(MXU_DTYPE), w_ref[...].astype(MXU_DTYPE),
                preferred_element_type=jnp.float32) + b_ref[...]
    h = _layernorm(h, g_ref[...], beta_ref[...])
    o_ref[0] = h + pos_ref[...]


def input_block(x, w, b, gamma, beta, pos):
    B, T, F = x.shape
    D = w.shape[1]
    return pl.pallas_call(
        _input_block_kernel,
        out_shape=jax.ShapeDtypeStruct((B, T, D), jnp.float32),
        grid=(B,),
        in_specs=[
            pl.BlockSpec((1, T, F), lambda bb: (bb, 0, 0)),
            pl.BlockSpec((F, D), lambda bb: (0, 0)),
            pl.BlockSpec((1, D), lambda bb: (0, 0)),
            pl.BlockSpec((1, D), lambda bb: (0, 0)),
            pl.BlockSpec((1, D), lambda bb: (0, 0)),
            pl.BlockSpec((T, D), lambda bb: (0, 0)),
        ],
        out_specs=pl.BlockSpec((1, T, D), lambda bb: (bb, 0, 0)),
        compiler_params=_compiler_params(),
    )(x, w, b.reshape(1, D), gamma.reshape(1, D), beta.reshape(1, D), pos)


# ----------------------------------------------------------------------------
# Kernel 2: fused multi-head attention block
#   Q proj + fused KV proj + per-head attention (mask built in-kernel) +
#   output projection + residual + LayerNorm.  Grid over batch; heads unrolled.
# ----------------------------------------------------------------------------

def _mha_block_kernel(lens_ref, xq_ref, xkv_ref, wq_ref, bq_ref, wkv_ref, bkv_ref,
                      wo_ref, bo_ref, g_ref, beta_ref, o_ref, attn_ref,
                      *, n_heads, causal, use_pad, scale):
    d_model = wq_ref.shape[0]
    dk = d_model // n_heads
    xq = xq_ref[0]                                        # (Tq, D)
    xkv = xkv_ref[0]                                      # (Tk, D)
    tq, tk = xq.shape[0], xkv.shape[0]

    q = jnp.dot(xq.astype(MXU_DTYPE), wq_ref[...].astype(MXU_DTYPE),
                preferred_element_type=jnp.float32) + bq_ref[...]          # (Tq, D)
    kv = jnp.dot(xkv.astype(MXU_DTYPE), wkv_ref[...].astype(MXU_DTYPE),
                 preferred_element_type=jnp.float32) + bkv_ref[...]        # (Tk, 2D)
    k = kv[:, :d_model]
    v = kv[:, d_model:]

    # Additive mask built in-kernel (no HBM mask tensor).
    neg = jnp.zeros((tq, tk), jnp.float32)
    kpos = jax.lax.broadcasted_iota(jnp.int32, (tq, tk), 1)
    if use_pad:
        klen = lens_ref[pl.program_id(0)]
        neg = jnp.where(kpos >= klen, _NEG_INF, neg)
    if causal:
        qpos = jax.lax.broadcasted_iota(jnp.int32, (tq, tk), 0)
        neg = jnp.where(kpos > qpos, _NEG_INF, neg)

    ctx_heads = []
    for h in range(n_heads):                              # unrolled; all heads in one launch
        lo, hi = h * dk, (h + 1) * dk
        qh, kh, vh = q[:, lo:hi], k[:, lo:hi], v[:, lo:hi]
        s = jnp.dot(qh.astype(MXU_DTYPE), kh.astype(MXU_DTYPE).T,
                    preferred_element_type=jnp.float32) * scale + neg
        s_max = jnp.max(s, axis=-1, keepdims=True)
        p = jnp.exp(s - s_max)
        attn = p / jnp.sum(p, axis=-1, keepdims=True)
        attn_ref[0, h] = attn
        ctx_heads.append(jnp.dot(attn.astype(MXU_DTYPE), vh.astype(MXU_DTYPE),
                                 preferred_element_type=jnp.float32))
    ctx = jnp.concatenate(ctx_heads, axis=-1)             # merged lane-dense (Tq, D)

    out = jnp.dot(ctx.astype(MXU_DTYPE), wo_ref[...].astype(MXU_DTYPE),
                  preferred_element_type=jnp.float32) + bo_ref[...]
    y = out + xq                                          # residual
    o_ref[0] = _layernorm(y, g_ref[...], beta_ref[...])


def mha_block(x_q, x_kv, lens, mp, gamma, beta, *, n_heads, causal, use_pad):
    """x_q: (B, Tq, D), x_kv: (B, Tk, D), lens: (B,) int32 (key lengths, used iff use_pad)."""
    B, Tq, D = x_q.shape
    Tk = x_kv.shape[1]
    dk = D // n_heads
    kernel = functools.partial(
        _mha_block_kernel, n_heads=n_heads, causal=causal, use_pad=use_pad,
        scale=1.0 / math.sqrt(dk))
    out, attn = pl.pallas_call(
        kernel,
        out_shape=(
            jax.ShapeDtypeStruct((B, Tq, D), jnp.float32),
            jax.ShapeDtypeStruct((B, n_heads, Tq, Tk), jnp.float32),
        ),
        grid_spec=pltpu.PrefetchScalarGridSpec(
            num_scalar_prefetch=1,
            grid=(B,),
            in_specs=[
                pl.BlockSpec((1, Tq, D), lambda bb, lens_r: (bb, 0, 0)),
                pl.BlockSpec((1, Tk, D), lambda bb, lens_r: (bb, 0, 0)),
                pl.BlockSpec((D, D), lambda bb, lens_r: (0, 0)),
                pl.BlockSpec((1, D), lambda bb, lens_r: (0, 0)),
                pl.BlockSpec((D, 2 * D), lambda bb, lens_r: (0, 0)),
                pl.BlockSpec((1, 2 * D), lambda bb, lens_r: (0, 0)),
                pl.BlockSpec((D, D), lambda bb, lens_r: (0, 0)),
                pl.BlockSpec((1, D), lambda bb, lens_r: (0, 0)),
                pl.BlockSpec((1, D), lambda bb, lens_r: (0, 0)),
                pl.BlockSpec((1, D), lambda bb, lens_r: (0, 0)),
            ],
            out_specs=(
                pl.BlockSpec((1, Tq, D), lambda bb, lens_r: (bb, 0, 0)),
                pl.BlockSpec((1, n_heads, Tq, Tk), lambda bb, lens_r: (bb, 0, 0, 0)),
            ),
        ),
        compiler_params=_compiler_params(),
    )(lens, x_q, x_kv,
      mp["wq"], mp["bq"].reshape(1, D),
      mp["wkv"], mp["bkv"].reshape(1, 2 * D),
      mp["wo"], mp["bo"].reshape(1, D),
      gamma.reshape(1, D), beta.reshape(1, D))
    return out, attn


# ----------------------------------------------------------------------------
# Kernel 3: fused position-wise FFN block  (FFN + residual + LayerNorm), row-tiled
# ----------------------------------------------------------------------------

def _ffn_block_kernel(x_ref, w1_ref, b1_ref, w2_ref, b2_ref, g_ref, beta_ref, o_ref):
    x = x_ref[...]                                        # (tile_m, D)
    h = jnp.dot(x.astype(MXU_DTYPE), w1_ref[...].astype(MXU_DTYPE),
                preferred_element_type=jnp.float32) + b1_ref[...]
    h = jnp.maximum(h, 0.0)
    f = jnp.dot(h.astype(MXU_DTYPE), w2_ref[...].astype(MXU_DTYPE),
                preferred_element_type=jnp.float32) + b2_ref[...]
    o_ref[...] = _layernorm(f + x, g_ref[...], beta_ref[...])


def ffn_block(x, w1, b1, w2, b2, gamma, beta):
    M, D = x.shape
    F = w1.shape[1]
    tm = _row_tile(M)
    return pl.pallas_call(
        _ffn_block_kernel,
        out_shape=jax.ShapeDtypeStruct((M, D), jnp.float32),
        grid=(M // tm,),
        in_specs=[
            pl.BlockSpec((tm, D), lambda i: (i, 0)),
            pl.BlockSpec((D, F), lambda i: (0, 0)),
            pl.BlockSpec((1, F), lambda i: (0, 0)),
            pl.BlockSpec((F, D), lambda i: (0, 0)),
            pl.BlockSpec((1, D), lambda i: (0, 0)),
            pl.BlockSpec((1, D), lambda i: (0, 0)),
            pl.BlockSpec((1, D), lambda i: (0, 0)),
        ],
        out_specs=pl.BlockSpec((tm, D), lambda i: (i, 0)),
        compiler_params=_compiler_params(),
    )(x, w1, b1.reshape(1, F), w2, b2.reshape(1, D), gamma.reshape(1, D), beta.reshape(1, D))


# ----------------------------------------------------------------------------
# Kernel 4: fused output head  (vocab linear + log_softmax), row-tiled
# ----------------------------------------------------------------------------

def _head_kernel(x_ref, w_ref, b_ref, o_ref):
    logits = jnp.dot(x_ref[...].astype(MXU_DTYPE), w_ref[...].astype(MXU_DTYPE),
                     preferred_element_type=jnp.float32) + b_ref[...]
    m = jnp.max(logits, axis=-1, keepdims=True)
    z = logits - m
    lse = jnp.log(jnp.sum(jnp.exp(z), axis=-1, keepdims=True))
    o_ref[...] = z - lse


def head_logsoftmax(x, w, b):
    M, D = x.shape
    V = w.shape[1]
    tm = _row_tile(M)
    return pl.pallas_call(
        _head_kernel,
        out_shape=jax.ShapeDtypeStruct((M, V), jnp.float32),
        grid=(M // tm,),
        in_specs=[
            pl.BlockSpec((tm, D), lambda i: (i, 0)),
            pl.BlockSpec((D, V), lambda i: (0, 0)),
            pl.BlockSpec((1, V), lambda i: (0, 0)),
        ],
        out_specs=pl.BlockSpec((tm, V), lambda i: (i, 0)),
        compiler_params=_compiler_params(),
    )(x, w, b.reshape(1, V))


# ----------------------------------------------------------------------------
# Model glue (positional table, embedding gather, reshapes) in plain JAX
# ----------------------------------------------------------------------------

def sinusoid_pos_encoding(length, d_model):
    pos = jnp.arange(length, dtype=jnp.float32)[:, None]
    i = jnp.arange(d_model, dtype=jnp.float32)[None, :]
    angle = pos / jnp.power(10000.0, (2.0 * jnp.floor(i / 2.0)) / d_model)
    return jnp.where(jnp.mod(i, 2) == 0, jnp.sin(angle), jnp.cos(angle))  # (length, d_model)


def speech_transformer_forward(params, enc_inputs, enc_inputs_lens, dec_inputs, cfg):
    B, T, _ = enc_inputs.shape
    U = dec_inputs.shape[1]
    D, H, V = cfg["d_model"], cfg["n_heads"], cfg["vocab"]

    enc_lens = enc_inputs_lens.astype(jnp.int32)
    pos_T = sinusoid_pos_encoding(T, D)
    pos_U = sinusoid_pos_encoding(U, D)

    # -------------------- Encoder --------------------
    ep = params["enc"]
    x = input_block(enc_inputs, ep["w_in"], ep["b_in"], ep["ln_in_g"], ep["ln_in_b"], pos_T)

    enc_self_attns = []
    for lp in ep["layers"]:
        x, attn = mha_block(x, x, enc_lens, lp["mha"], lp["ln1_g"], lp["ln1_b"],
                            n_heads=H, causal=False, use_pad=True)
        x = ffn_block(x.reshape(B * T, D), lp["ff_w1"], lp["ff_b1"], lp["ff_w2"], lp["ff_b2"],
                      lp["ln2_g"], lp["ln2_b"]).reshape(B, T, D)
        enc_self_attns.append(attn)                                   # (B, H, T, T)

    enc_outputs = x                                                    # (B, T, D)
    enc_output_lens = enc_inputs_lens
    enc_output_prob = head_logsoftmax(enc_outputs.reshape(B * T, D),
                                      ep["w_ctc"], ep["b_ctc"]).reshape(B, T, V)

    # -------------------- Decoder --------------------
    dp = params["dec"]
    emb = jnp.take(dp["embed"], dec_inputs, axis=0) * math.sqrt(D)     # (B, U, D)
    y = emb + pos_U[None]

    full_lens = jnp.full((B,), U, dtype=jnp.int32)                     # unused (use_pad=False)
    dec_self_attns, enc_dec_attns = [], []
    for lp in dp["layers"]:
        # decoder self-attention: causal mask only (matches reference wiring)
        y, self_attn = mha_block(y, y, full_lens, lp["self_mha"], lp["ln1_g"], lp["ln1_b"],
                                 n_heads=H, causal=True, use_pad=False)
        # encoder-decoder cross attention: pad mask from encoder output lengths
        y, cross_attn = mha_block(y, enc_outputs, enc_lens, lp["cross_mha"],
                                  lp["ln2_g"], lp["ln2_b"],
                                  n_heads=H, causal=False, use_pad=True)
        y = ffn_block(y.reshape(B * U, D), lp["ff_w1"], lp["ff_b1"], lp["ff_w2"], lp["ff_b2"],
                      lp["ln3_g"], lp["ln3_b"]).reshape(B, U, D)
        dec_self_attns.append(self_attn)                               # (B, H, U, U)
        enc_dec_attns.append(cross_attn)                               # (B, H, U, T)

    dec_output_prob = head_logsoftmax(y.reshape(B * U, D),
                                      dp["w_gen"], dp["b_gen"]).reshape(B, U, V)

    return (enc_output_prob, enc_output_lens, dec_output_prob,
            enc_self_attns, dec_self_attns, enc_dec_attns)


# ----------------------------------------------------------------------------
# Deterministic parameter initialization
# ----------------------------------------------------------------------------

def init_params(key, cfg):
    D, F, V, Fdim = cfg["d_model"], cfg["d_ff"], cfg["vocab"], cfg["feat_dim"]

    def dense(k, din, dout):
        return (0.05 * jax.random.normal(k, (din, dout), jnp.float32),
                jnp.zeros((dout,), jnp.float32))

    def mha_params(k):
        ks = jax.random.split(k, 4)
        wq, bq = dense(ks[0], D, D)
        wk, bk = dense(ks[1], D, D)
        wv, bv = dense(ks[2], D, D)
        wo, bo = dense(ks[3], D, D)
        return dict(wq=wq, bq=bq,
                    wkv=jnp.concatenate([wk, wv], axis=1),
                    bkv=jnp.concatenate([bk, bv], axis=0),
                    wo=wo, bo=bo)

    def enc_layer(k):
        ks = jax.random.split(k, 3)
        w1, b1 = dense(ks[1], D, F)
        w2, b2 = dense(ks[2], F, D)
        return dict(mha=mha_params(ks[0]),
                    ln1_g=jnp.ones((D,)), ln1_b=jnp.zeros((D,)),
                    ln2_g=jnp.ones((D,)), ln2_b=jnp.zeros((D,)),
                    ff_w1=w1, ff_b1=b1, ff_w2=w2, ff_b2=b2)

    def dec_layer(k):
        ks = jax.random.split(k, 4)
        w1, b1 = dense(ks[2], D, F)
        w2, b2 = dense(ks[3], F, D)
        return dict(self_mha=mha_params(ks[0]), cross_mha=mha_params(ks[1]),
                    ln1_g=jnp.ones((D,)), ln1_b=jnp.zeros((D,)),
                    ln2_g=jnp.ones((D,)), ln2_b=jnp.zeros((D,)),
                    ln3_g=jnp.ones((D,)), ln3_b=jnp.zeros((D,)),
                    ff_w1=w1, ff_b1=b1, ff_w2=w2, ff_b2=b2)

    keys = jax.random.split(key, 8)
    w_in, b_in = dense(keys[0], Fdim, D)
    w_ctc, b_ctc = dense(keys[1], D, V)
    w_gen, b_gen = dense(keys[2], D, V)
    enc = dict(w_in=w_in, b_in=b_in,
               ln_in_g=jnp.ones((D,)), ln_in_b=jnp.zeros((D,)),
               layers=[enc_layer(keys[3])],
               w_ctc=w_ctc, b_ctc=b_ctc)
    dec = dict(embed=0.05 * jax.random.normal(keys[4], (V, D), jnp.float32),
               layers=[dec_layer(keys[5])],
               w_gen=w_gen, b_gen=b_gen)
    return dict(enc=enc, dec=dec)


# ----------------------------------------------------------------------------
# Main
# ----------------------------------------------------------------------------

if __name__ == "__main__":
    cfg = dict(d_model=32, n_heads=4, d_ff=64, vocab=16, feat_dim=16)
    B, T_enc, T_dec = 2, 8, 8

    key = jax.random.PRNGKey(0)
    k_in, k_dec, k_par = jax.random.split(key, 3)

    enc_inputs = jax.random.normal(k_in, (B, T_enc, cfg["feat_dim"]), jnp.float32)
    enc_inputs_lens = jnp.array([8, 6], dtype=jnp.int32)
    dec_inputs = jax.random.randint(k_dec, (B, T_dec), 0, cfg["vocab"], dtype=jnp.int32)

    params = init_params(k_par, cfg)

    fwd = jax.jit(functools.partial(speech_transformer_forward, cfg=cfg))
    outputs = fwd(params, enc_inputs, enc_inputs_lens, dec_inputs)
    (enc_output_prob, enc_output_lens, dec_output_prob,
     enc_self_attns, dec_self_attns, enc_dec_attns) = outputs

    jax.block_until_ready(enc_output_prob)
    jax.block_until_ready(dec_output_prob)
    jax.block_until_ready(enc_self_attns[0])
    jax.block_until_ready(dec_self_attns[0])
    jax.block_until_ready(enc_dec_attns[0])

    # shape checks
    assert enc_output_prob.shape == (B, T_enc, cfg["vocab"])
    assert dec_output_prob.shape == (B, T_dec, cfg["vocab"])
    assert enc_self_attns[0].shape == (B, cfg["n_heads"], T_enc, T_enc)
    assert dec_self_attns[0].shape == (B, cfg["n_heads"], T_dec, T_dec)
    assert enc_dec_attns[0].shape == (B, cfg["n_heads"], T_dec, T_enc)

    # sanity checks: finite log-probs, softmax rows sum to 1, masks respected
    assert bool(jnp.all(jnp.isfinite(enc_output_prob)))
    assert bool(jnp.all(jnp.isfinite(dec_output_prob)))
    assert bool(jnp.allclose(jnp.sum(enc_self_attns[0], axis=-1), 1.0, atol=1e-4))
    assert float(jnp.max(jnp.abs(enc_self_attns[0][1, :, :, 6:]))) < 1e-6   # pad mask (len=6)
    assert float(jnp.max(jnp.abs(dec_self_attns[0][:, :, 0, 1:]))) < 1e-6   # causal mask
    assert float(jnp.max(jnp.abs(enc_dec_attns[0][1, :, :, 6:]))) < 1e-6    # cross pad mask

    print("KERNEL_OK")
</pallas_src>

<mosaic_0001>
module attributes {stable_mosaic.version = 11 : i64} {
  func.func @_input_block_kernel(%arg0: i32, %arg1: memref<1x8x16xf32, #tpu.memory_space<vmem>>, %arg2: memref<16x32xf32, #tpu.memory_space<vmem>>, %arg3: memref<1x32xf32, #tpu.memory_space<vmem>>, %arg4: memref<1x32xf32, #tpu.memory_space<vmem>>, %arg5: memref<1x32xf32, #tpu.memory_space<vmem>>, %arg6: memref<8x32xf32, #tpu.memory_space<vmem>>, %arg7: memref<1x8x32xf32, #tpu.memory_space<vmem>>) attributes {dimension_semantics = [#tpu.dimension_semantics<parallel>], iteration_bounds = array<i64: 2>, scalar_prefetch = 0 : i64, scratch_operands = 0 : i64, tpu.core_type = #tpu.core_type<tc>, window_params = [{transform_indices = @transform_0, window_bounds = array<i64: 1, 8, 16>}, {pipeline_mode = #tpu.pipeline_mode<synchronous>, transform_indices = @transform_1, window_bounds = array<i64: 16, 32>}, {pipeline_mode = #tpu.pipeline_mode<synchronous>, transform_indices = @transform_2, window_bounds = array<i64: 1, 32>}, {pipeline_mode = #tpu.pipeline_mode<synchronous>, transform_indices = @transform_3, window_bounds = array<i64: 1, 32>}, {pipeline_mode = #tpu.pipeline_mode<synchronous>, transform_indices = @transform_4, window_bounds = array<i64: 1, 32>}, {pipeline_mode = #tpu.pipeline_mode<synchronous>, transform_indices = @transform_5, window_bounds = array<i64: 8, 32>}, {transform_indices = @transform_6, window_bounds = array<i64: 1, 8, 32>}]} {
    %c0 = arith.constant 0 : index
    %c0_0 = arith.constant 0 : index
    %c0_1 = arith.constant 0 : index
    %0 = vector.load %arg1[%c0, %c0_0, %c0_1] : memref<1x8x16xf32, #tpu.memory_space<vmem>>, vector<1x8x16xf32>
    %1 = vector.shape_cast %0 : vector<1x8x16xf32> to vector<8x16xf32>
    %c0_2 = arith.constant 0 : index
    %c0_3 = arith.constant 0 : index
    %2 = vector.load %arg2[%c0_2, %c0_3] : memref<16x32xf32, #tpu.memory_space<vmem>>, vector<16x32xf32>
    %cst = arith.constant dense<0.000000e+00> : vector<8x32xf32>
    %3 = tpu.matmul %1, %2, %cst {dimension_numbers = #tpu.dot_dimension_numbers<[1], [0], [0], [1], [0, 0, 1, 1], [], []>} : vector<8x16xf32>, vector<16x32xf32>, vector<8x32xf32> -> vector<8x32xf32>
    %c0_4 = arith.constant 0 : index
    %c0_5 = arith.constant 0 : index
    %4 = vector.load %arg3[%c0_4, %c0_5] : memref<1x32xf32, #tpu.memory_space<vmem>>, vector<1x32xf32>
    %5 = vector.broadcast %4 : vector<1x32xf32> to vector<8x32xf32>
    %6 = arith.addf %3, %5 : vector<8x32xf32>
    %c0_6 = arith.constant 0 : index
    %c0_7 = arith.constant 0 : index
    %7 = vector.load %arg4[%c0_6, %c0_7] : memref<1x32xf32, #tpu.memory_space<vmem>>, vector<1x32xf32>
    %c0_8 = arith.constant 0 : index
    %c0_9 = arith.constant 0 : index
    %8 = vector.load %arg5[%c0_8, %c0_9] : memref<1x32xf32, #tpu.memory_space<vmem>>, vector<1x32xf32>
    %cst_10 = arith.constant dense<0.000000e+00> : vector<8xf32>
    %9 = vector.multi_reduction <add>, %6, %cst_10 [1] : vector<8x32xf32> to vector<8xf32>
    %10 = vector.shape_cast %9 : vector<8xf32> to vector<8x1xf32>
    %cst_11 = arith.constant 3.200000e+01 : f32
    %11 = vector.broadcast %cst_11 : f32 to vector<8x1xf32>
    %12 = arith.divf %10, %11 : vector<8x1xf32>
    %13 = vector.broadcast %12 : vector<8x1xf32> to vector<8x32xf32>
    %14 = arith.subf %6, %13 : vector<8x32xf32>
    %15 = arith.mulf %14, %14 : vector<8x32xf32>
    %cst_12 = arith.constant dense<0.000000e+00> : vector<8xf32>
    %16 = vector.multi_reduction <add>, %15, %cst_12 [1] : vector<8x32xf32> to vector<8xf32>
    %17 = vector.shape_cast %16 : vector<8xf32> to vector<8x1xf32>
    %cst_13 = arith.constant 3.200000e+01 : f32
    %18 = vector.broadcast %cst_13 : f32 to vector<8x1xf32>
    %19 = arith.divf %17, %18 : vector<8x1xf32>
    %20 = vector.broadcast %12 : vector<8x1xf32> to vector<8x32xf32>
    %21 = arith.subf %6, %20 : vector<8x32xf32>
    %cst_14 = arith.constant 9.99999974E-6 : f32
    %22 = vector.broadcast %cst_14 : f32 to vector<8x1xf32>
    %23 = arith.addf %19, %22 : vector<8x1xf32>
    %24 = math.rsqrt %23 : vector<8x1xf32>
    %25 = vector.broadcast %24 : vector<8x1xf32> to vector<8x32xf32>
    %26 = arith.mulf %21, %25 : vector<8x32xf32>
    %27 = vector.broadcast %7 : vector<1x32xf32> to vector<8x32xf32>
    %28 = arith.mulf %26, %27 : vector<8x32xf32>
    %29 = vector.broadcast %8 : vector<1x32xf32> to vector<8x32xf32>
    %30 = arith.addf %28, %29 : vector<8x32xf32>
    %c0_15 = arith.constant 0 : index
    %c0_16 = arith.constant 0 : index
    %31 = vector.load %arg6[%c0_15, %c0_16] : memref<8x32xf32, #tpu.memory_space<vmem>>, vector<8x32xf32>
    %32 = arith.addf %30, %31 : vector<8x32xf32>
    %c0_17 = arith.constant 0 : index
    %c0_18 = arith.constant 0 : index
    %c0_19 = arith.constant 0 : index
    %33 = vector.load %arg7[%c0_17, %c0_18, %c0_19] : memref<1x8x32xf32, #tpu.memory_space<vmem>>, vector<1x8x32xf32>
    %34 = vector.shape_cast %33 : vector<1x8x32xf32> to vector<8x32xf32>
    %35 = vector.shape_cast %32 : vector<8x32xf32> to vector<1x8x32xf32>
    tpu.vector_store %arg7[%c0_17, %c0_18, %c0_19], %35 {strides = array<i32>} : memref<1x8x32xf32, #tpu.memory_space<vmem>>, vector<1x8x32xf32>,
    return
  }
  func.func @transform_0(%arg0: i32) -> (i32, i32, i32) {
    %c0_i32 = arith.constant 0 : i32
    %c0_i32_0 = arith.constant 0 : i32
    %c0_i32_1 = arith.constant 0 : i32
    return %arg0, %c0_i32, %c0_i32_0 : i32, i32, i32
  }
  func.func @transform_1(%arg0: i32) -> (i32, i32) {
    %c0_i32 = arith.constant 0 : i32
    %c0_i32_0 = arith.constant 0 : i32
    %c0_i32_1 = arith.constant 0 : i32
    return %c0_i32, %c0_i32_0 : i32, i32
  }
  func.func @transform_2(%arg0: i32) -> (i32, i32) {
    %c0_i32 = arith.constant 0 : i32
    %c0_i32_0 = arith.constant 0 : i32
    %c0_i32_1 = arith.constant 0 : i32
    return %c0_i32, %c0_i32_0 : i32, i32
  }
  func.func @transform_3(%arg0: i32) -> (i32, i32) {
    %c0_i32 = arith.constant 0 : i32
    %c0_i32_0 = arith.constant 0 : i32
    %c0_i32_1 = arith.constant 0 : i32
    return %c0_i32, %c0_i32_0 : i32, i32
  }
  func.func @transform_4(%arg0: i32) -> (i32, i32) {
    %c0_i32 = arith.constant 0 : i32
    %c0_i32_0 = arith.constant 0 : i32
    %c0_i32_1 = arith.constant 0 : i32
    return %c0_i32, %c0_i32_0 : i32, i32
  }
  func.func @transform_5(%arg0: i32) -> (i32, i32) {
    %c0_i32 = arith.constant 0 : i32
    %c0_i32_0 = arith.constant 0 : i32
    %c0_i32_1 = arith.constant 0 : i32
    return %c0_i32, %c0_i32_0 : i32, i32
  }
  func.func @transform_6(%arg0: i32) -> (i32, i32, i32) {
    %c0_i32 = arith.constant 0 : i32
    %c0_i32_0 = arith.constant 0 : i32
    %c0_i32_1 = arith.constant 0 : i32
    return %arg0, %c0_i32, %c0_i32_0 : i32, i32, i32
  }
}

module attributes {stable_mosaic.version = 11 : i64} {
  func.func @_ffn_block_kernel(%arg0: i32, %arg1: memref<16x32xf32, #tpu.memory_space<vmem>>, %arg2: memref<32x64xf32, #tpu.memory_space<vmem>>, %arg3: memref<1x64xf32, #tpu.memory_space<vmem>>, %arg4: memref<64x32xf32, #tpu.memory_space<vmem>>, %arg5: memref<1x32xf32, #tpu.memory_space<vmem>>, %arg6: memref<1x32xf32, #tpu.memory_space<vmem>>, %arg7: memref<1x32xf32, #tpu.memory_space<vmem>>, %arg8: memref<16x32xf32, #tpu.memory_space<vmem>>) attributes {dimension_semantics = [#tpu.dimension_semantics<parallel>], iteration_bounds = array<i64: 1>, scalar_prefetch = 0 : i64, scratch_operands = 0 : i64, tpu.core_type = #tpu.core_type<tc>, window_params = [{transform_indices = @transform_0, window_bounds = array<i64: 16, 32>}, {pipeline_mode = #tpu.pipeline_mode<synchronous>, transform_indices = @transform_1, window_bounds = array<i64: 32, 64>}, {pipeline_mode = #tpu.pipeline_mode<synchronous>, transform_indices = @transform_2, window_bounds = array<i64: 1, 64>}, {pipeline_mode = #tpu.pipeline_mode<synchronous>, transform_indices = @transform_3, window_bounds = array<i64: 64, 32>}, {pipeline_mode = #tpu.pipeline_mode<synchronous>, transform_indices = @transform_4, window_bounds = array<i64: 1, 32>}, {pipeline_mode = #tpu.pipeline_mode<synchronous>, transform_indices = @transform_5, window_bounds = array<i64: 1, 32>}, {pipeline_mode = #tpu.pipeline_mode<synchronous>, transform_indices = @transform_6, window_bounds = array<i64: 1, 32>}, {transform_indices = @transform_7, window_bounds = array<i64: 16, 32>}]} {
    %c0 = arith.constant 0 : index
    %c0_0 = arith.constant 0 : index
    %0 = vector.load %arg1[%c0, %c0_0] : memref<16x32xf32, #tpu.memory_space<vmem>>, vector<16x32xf32>
    %c0_1 = arith.constant 0 : index
    %c0_2 = arith.constant 0 : index
    %1 = vector.load %arg2[%c0_1, %c0_2] : memref<32x64xf32, #tpu.memory_space<vmem>>, vector<32x64xf32>
    %cst = arith.constant dense<0.000000e+00> : vector<16x64xf32>
    %2 = tpu.matmul %0, %1, %cst {dimension_numbers = #tpu.dot_dimension_numbers<[1], [0], [0], [1], [0, 0, 1, 1], [], []>} : vector<16x32xf32>, vector<32x64xf32>, vector<16x64xf32> -> vector<16x64xf32>
    %c0_3 = arith.constant 0 : index
    %c0_4 = arith.constant 0 : index
    %3 = vector.load %arg3[%c0_3, %c0_4] : memref<1x64xf32, #tpu.memory_space<vmem>>, vector<1x64xf32>
    %4 = vector.broadcast %3 : vector<1x64xf32> to vector<16x64xf32>
    %5 = arith.addf %2, %4 : vector<16x64xf32>
    %cst_5 = arith.constant 0.000000e+00 : f32
    %6 = vector.broadcast %cst_5 : f32 to vector<16x64xf32>
    %7 = arith.maximumf %5, %6 : vector<16x64xf32>
    %c0_6 = arith.constant 0 : index
    %c0_7 = arith.constant 0 : index
    %8 = vector.load %arg4[%c0_6, %c0_7] : memref<64x32xf32, #tpu.memory_space<vmem>>, vector<64x32xf32>
    %cst_8 = arith.constant dense<0.000000e+00> : vector<16x32xf32>
    %9 = tpu.matmul %7, %8, %cst_8 {dimension_numbers = #tpu.dot_dimension_numbers<[1], [0], [0], [1], [0, 0, 1, 1], [], []>} : vector<16x64xf32>, vector<64x32xf32>, vector<16x32xf32> -> vector<16x32xf32>
    %c0_9 = arith.constant 0 : index
    %c0_10 = arith.constant 0 : index
    %10 = vector.load %arg5[%c0_9, %c0_10] : memref<1x32xf32, #tpu.memory_space<vmem>>, vector<1x32xf32>
    %11 = vector.broadcast %10 : vector<1x32xf32> to vector<16x32xf32>
    %12 = arith.addf %9, %11 : vector<16x32xf32>
    %13 = arith.addf %12, %0 : vector<16x32xf32>
    %c0_11 = arith.constant 0 : index
    %c0_12 = arith.constant 0 : index
    %14 = vector.load %arg6[%c0_11, %c0_12] : memref<1x32xf32, #tpu.memory_space<vmem>>, vector<1x32xf32>
    %c0_13 = arith.constant 0 : index
    %c0_14 = arith.constant 0 : index
    %15 = vector.load %arg7[%c0_13, %c0_14] : memref<1x32xf32, #tpu.memory_space<vmem>>, vector<1x32xf32>
    %cst_15 = arith.constant dense<0.000000e+00> : vector<16xf32>
    %16 = vector.multi_reduction <add>, %13, %cst_15 [1] : vector<16x32xf32> to vector<16xf32>
    %17 = vector.shape_cast %16 : vector<16xf32> to vector<16x1xf32>
    %cst_16 = arith.constant 3.200000e+01 : f32
    %18 = vector.broadcast %cst_16 : f32 to vector<16x1xf32>
    %19 = arith.divf %17, %18 : vector<16x1xf32>
    %20 = vector.broadcast %19 : vector<16x1xf32> to vector<16x32xf32>
    %21 = arith.subf %13, %20 : vector<16x32xf32>
    %22 = arith.mulf %21, %21 : vector<16x32xf32>
    %cst_17 = arith.constant dense<0.000000e+00> : vector<16xf32>
    %23 = vector.multi_reduction <add>, %22, %cst_17 [1] : vector<16x32xf32> to vector<16xf32>
    %24 = vector.shape_cast %23 : vector<16xf32> to vector<16x1xf32>
    %cst_18 = arith.constant 3.200000e+01 : f32
    %25 = vector.broadcast %cst_18 : f32 to vector<16x1xf32>
    %26 = arith.divf %24, %25 : vector<16x1xf32>
    %27 = vector.broadcast %19 : vector<16x1xf32> to vector<16x32xf32>
    %28 = arith.subf %13, %27 : vector<16x32xf32>
    %cst_19 = arith.constant 9.99999974E-6 : f32
    %29 = vector.broadcast %cst_19 : f32 to vector<16x1xf32>
    %30 = arith.addf %26, %29 : vector<16x1xf32>
    %31 = math.rsqrt %30 : vector<16x1xf32>
    %32 = vector.broadcast %31 : vector<16x1xf32> to vector<16x32xf32>
    %33 = arith.mulf %28, %32 : vector<16x32xf32>
    %34 = vector.broadcast %14 : vector<1x32xf32> to vector<16x32xf32>
    %35 = arith.mulf %33, %34 : vector<16x32xf32>
    %36 = vector.broadcast %15 : vector<1x32xf32> to vector<16x32xf32>
    %37 = arith.addf %35, %36 : vector<16x32xf32>
    %c0_20 = arith.constant 0 : index
    %c0_21 = arith.constant 0 : index
    %38 = vector.load %arg8[%c0_20, %c0_21] : memref<16x32xf32, #tpu.memory_space<vmem>>, vector<16x32xf32>
    tpu.vector_store %arg8[%c0_20, %c0_21], %37 {strides = array<i32>} : memref<16x32xf32, #tpu.memory_space<vmem>>, vector<16x32xf32>,
    return
  }
  func.func @transform_0(%arg0: i32) -> (i32, i32) {
    %c0_i32 = arith.constant 0 : i32
    %c0_i32_0 = arith.constant 0 : i32
    return %arg0, %c0_i32 : i32, i32
  }
  func.func @transform_1(%arg0: i32) -> (i32, i32) {
    %c0_i32 = arith.constant 0 : i32
    %c0_i32_0 = arith.constant 0 : i32
    %c0_i32_1 = arith.constant 0 : i32
    return %c0_i32, %c0_i32_0 : i32, i32
  }
  func.func @transform_2(%arg0: i32) -> (i32, i32) {
    %c0_i32 = arith.constant 0 : i32
    %c0_i32_0 = arith.constant 0 : i32
    %c0_i32_1 = arith.constant 0 : i32
    return %c0_i32, %c0_i32_0 : i32, i32
  }
  func.func @transform_3(%arg0: i32) -> (i32, i32) {
    %c0_i32 = arith.constant 0 : i32
    %c0_i32_0 = arith.constant 0 : i32
    %c0_i32_1 = arith.constant 0 : i32
    return %c0_i32, %c0_i32_0 : i32, i32
  }
  func.func @transform_4(%arg0: i32) -> (i32, i32) {
    %c0_i32 = arith.constant 0 : i32
    %c0_i32_0 = arith.constant 0 : i32
    %c0_i32_1 = arith.constant 0 : i32
    return %c0_i32, %c0_i32_0 : i32, i32
  }
  func.func @transform_5(%arg0: i32) -> (i32, i32) {
    %c0_i32 = arith.constant 0 : i32
    %c0_i32_0 = arith.constant 0 : i32
    %c0_i32_1 = arith.constant 0 : i32
    return %c0_i32, %c0_i32_0 : i32, i32
  }
  func.func @transform_6(%arg0: i32) -> (i32, i32) {
    %c0_i32 = arith.constant 0 : i32
    %c0_i32_0 = arith.constant 0 : i32
    %c0_i32_1 = arith.constant 0 : i32
    return %c0_i32, %c0_i32_0 : i32, i32
  }
  func.func @transform_7(%arg0: i32) -> (i32, i32) {
    %c0_i32 = arith.constant 0 : i32
    %c0_i32_0 = arith.constant 0 : i32
    return %arg0, %c0_i32 : i32, i32
  }
}

module attributes {stable_mosaic.version = 11 : i64} {
  func.func @_mha_block_kernel(%arg0: i32, %arg1: memref<2xi32, #tpu.memory_space<smem>>, %arg2: memref<1x8x32xf32, #tpu.memory_space<vmem>>, %arg3: memref<1x8x32xf32, #tpu.memory_space<vmem>>, %arg4: memref<32x32xf32, #tpu.memory_space<vmem>>, %arg5: memref<1x32xf32, #tpu.memory_space<vmem>>, %arg6: memref<32x64xf32, #tpu.memory_space<vmem>>, %arg7: memref<1x64xf32, #tpu.memory_space<vmem>>, %arg8: memref<32x32xf32, #tpu.memory_space<vmem>>, %arg9: memref<1x32xf32, #tpu.memory_space<vmem>>, %arg10: memref<1x32xf32, #tpu.memory_space<vmem>>, %arg11: memref<1x32xf32, #tpu.memory_space<vmem>>, %arg12: memref<1x8x32xf32, #tpu.memory_space<vmem>>, %arg13: memref<1x4x8x8xf32, #tpu.memory_space<vmem>>) attributes {dimension_semantics = [#tpu.dimension_semantics<parallel>], iteration_bounds = array<i64: 2>, scalar_prefetch = 1 : i64, scratch_operands = 0 : i64, tpu.core_type = #tpu.core_type<tc>, window_params = [{transform_indices = @transform_0, window_bounds = array<i64: 1, 8, 32>}, {transform_indices = @transform_1, window_bounds = array<i64: 1, 8, 32>}, {pipeline_mode = #tpu.pipeline_mode<synchronous>, transform_indices = @transform_2, window_bounds = array<i64: 32, 32>}, {pipeline_mode = #tpu.pipeline_mode<synchronous>, transform_indices = @transform_3, window_bounds = array<i64: 1, 32>}, {pipeline_mode = #tpu.pipeline_mode<synchronous>, transform_indices = @transform_4, window_bounds = array<i64: 32, 64>}, {pipeline_mode = #tpu.pipeline_mode<synchronous>, transform_indices = @transform_5, window_bounds = array<i64: 1, 64>}, {pipeline_mode = #tpu.pipeline_mode<synchronous>, transform_indices = @transform_6, window_bounds = array<i64: 32, 32>}, {pipeline_mode = #tpu.pipeline_mode<synchronous>, transform_indices = @transform_7, window_bounds = array<i64: 1, 32>}, {pipeline_mode = #tpu.pipeline_mode<synchronous>, transform_indices = @transform_8, window_bounds = array<i64: 1, 32>}, {pipeline_mode = #tpu.pipeline_mode<synchronous>, transform_indices = @transform_9, window_bounds = array<i64: 1, 32>}, {transform_indices = @transform_10, window_bounds = array<i64: 1, 8, 32>}, {transform_indices = @transform_11, window_bounds = array<i64: 1, 4, 8, 8>}]} {
    %c0 = arith.constant 0 : index
    %c0_0 = arith.constant 0 : index
    %c0_1 = arith.constant 0 : index
    %0 = vector.load %arg2[%c0, %c0_0, %c0_1] : memref<1x8x32xf32, #tpu.memory_space<vmem>>, vector<1x8x32xf32>
    %1 = vector.shape_cast %0 : vector<1x8x32xf32> to vector<8x32xf32>
    %c0_2 = arith.constant 0 : index
    %c0_3 = arith.constant 0 : index
    %c0_4 = arith.constant 0 : index
    %2 = vector.load %arg3[%c0_2, %c0_3, %c0_4] : memref<1x8x32xf32, #tpu.memory_space<vmem>>, vector<1x8x32xf32>
    %3 = vector.shape_cast %2 : vector<1x8x32xf32> to vector<8x32xf32>
    %c0_5 = arith.constant 0 : index
    %c0_6 = arith.constant 0 : index
    %4 = vector.load %arg4[%c0_5, %c0_6] : memref<32x32xf32, #tpu.memory_space<vmem>>, vector<32x32xf32>
    %cst = arith.constant dense<0.000000e+00> : vector<8x32xf32>
    %5 = tpu.matmul %1, %4, %cst {dimension_numbers = #tpu.dot_dimension_numbers<[1], [0], [0], [1], [0, 0, 1, 1], [], []>} : vector<8x32xf32>, vector<32x32xf32>, vector<8x32xf32> -> vector<8x32xf32>
    %c0_7 = arith.constant 0 : index
    %c0_8 = arith.constant 0 : index
    %6 = vector.load %arg5[%c0_7, %c0_8] : memref<1x32xf32, #tpu.memory_space<vmem>>, vector<1x32xf32>
    %7 = vector.broadcast %6 : vector<1x32xf32> to vector<8x32xf32>
    %8 = arith.addf %5, %7 : vector<8x32xf32>
    %c0_9 = arith.constant 0 : index
    %c0_10 = arith.constant 0 : index
    %9 = vector.load %arg6[%c0_9, %c0_10] : memref<32x64xf32, #tpu.memory_space<vmem>>, vector<32x64xf32>
    %cst_11 = arith.constant dense<0.000000e+00> : vector<8x64xf32>
    %10 = tpu.matmul %3, %9, %cst_11 {dimension_numbers = #tpu.dot_dimension_numbers<[1], [0], [0], [1], [0, 0, 1, 1], [], []>} : vector<8x32xf32>, vector<32x64xf32>, vector<8x64xf32> -> vector<8x64xf32>
    %c0_12 = arith.constant 0 : index
    %c0_13 = arith.constant 0 : index
    %11 = vector.load %arg7[%c0_12, %c0_13] : memref<1x64xf32, #tpu.memory_space<vmem>>, vector<1x64xf32>
    %12 = vector.broadcast %11 : vector<1x64xf32> to vector<8x64xf32>
    %13 = arith.addf %10, %12 : vector<8x64xf32>
    %14 = vector.extract_strided_slice %13 {offsets = [0, 0], sizes = [8, 32], strides = [1, 1]} : vector<8x64xf32> to vector<8x32xf32>
    %15 = vector.extract_strided_slice %13 {offsets = [0, 32], sizes = [8, 32], strides = [1, 1]} : vector<8x64xf32> to vector<8x32xf32>
    %cst_14 = arith.constant 0.000000e+00 : f32
    %16 = vector.broadcast %cst_14 : f32 to vector<8x8xf32>
    %17 = tpu.iota {dimensions = array<i32: 1>} : vector<8x8xi32>
    %18 = arith.index_cast %arg0 : i32 to index
    %19 = memref.load %arg1[%18] : memref<2xi32, #tpu.memory_space<smem>>
    %20 = vector.broadcast %19 : i32 to vector<8x8xi32>
    %21 = arith.cmpi sge, %17, %20 : vector<8x8xi32>
    %cst_15 = arith.constant -1.000000e+09 : f32
    %22 = vector.broadcast %cst_15 : f32 to vector<8x8xf32>
    %23 = arith.select %21, %22, %16 : vector<8x8xi1>, vector<8x8xf32>
    %24 = vector.extract_strided_slice %8 {offsets = [0, 0], sizes = [8, 8], strides = [1, 1]} : vector<8x32xf32> to vector<8x8xf32>
    %25 = vector.extract_strided_slice %14 {offsets = [0, 0], sizes = [8, 8], strides = [1, 1]} : vector<8x32xf32> to vector<8x8xf32>
    %26 = vector.extract_strided_slice %15 {offsets = [0, 0], sizes = [8, 8], strides = [1, 1]} : vector<8x32xf32> to vector<8x8xf32>
    %27 = tpu.transpose %25, [1, 0] : vector<8x8xf32> -> vector<8x8xf32>
    %cst_16 = arith.constant dense<0.000000e+00> : vector<8x8xf32>
    %28 = tpu.matmul %24, %27, %cst_16 {dimension_numbers = #tpu.dot_dimension_numbers<[1], [0], [0], [1], [0, 0, 1, 1], [], []>} : vector<8x8xf32>, vector<8x8xf32>, vector<8x8xf32> -> vector<8x8xf32>
    %cst_17 = arith.constant 0.353553385 : f32
    %29 = vector.broadcast %cst_17 : f32 to vector<8x8xf32>
    %30 = arith.mulf %28, %29 : vector<8x8xf32>
    %31 = arith.addf %30, %23 : vector<8x8xf32>
    %cst_18 = arith.constant dense<0xFF800000> : vector<8xf32>
    %32 = vector.multi_reduction <maximumf>, %31, %cst_18 [1] : vector<8x8xf32> to vector<8xf32>
    %33 = vector.shape_cast %32 : vector<8xf32> to vector<8x1xf32>
    %34 = vector.broadcast %33 : vector<8x1xf32> to vector<8x8xf32>
    %35 = arith.subf %31, %34 : vector<8x8xf32>
    %36 = math.exp %35 : vector<8x8xf32>
    %cst_19 = arith.constant dense<0.000000e+00> : vector<8xf32>
    %37 = vector.multi_reduction <add>, %36, %cst_19 [1] : vector<8x8xf32> to vector<8xf32>
    %38 = vector.shape_cast %37 : vector<8xf32> to vector<8x1xf32>
    %39 = vector.broadcast %38 : vector<8x1xf32> to vector<8x8xf32>
    %40 = arith.divf %36, %39 : vector<8x8xf32>
    %c0_20 = arith.constant 0 : index
    %c0_21 = arith.constant 0 : index
    %c0_22 = arith.constant 0 : index
    %c0_23 = arith.constant 0 : index
    %41 = vector.load %arg13[%c0_20, %c0_21, %c0_22, %c0_23] : memref<1x4x8x8xf32, #tpu.memory_space<vmem>>, vector<1x1x8x8xf32>
    %42 = vector.shape_cast %41 : vector<1x1x8x8xf32> to vector<8x8xf32>
    %43 = vector.shape_cast %40 : vector<8x8xf32> to vector<1x1x8x8xf32>
    tpu.vector_store %arg13[%c0_20, %c0_21, %c0_22, %c0_23], %43 {strides = array<i32>} : memref<1x4x8x8xf32, #tpu.memory_space<vmem>>, vector<1x1x8x8xf32>,
    %cst_24 = arith.constant dense<0.000000e+00> : vector<8x8xf32>
    %44 = tpu.matmul %40, %26, %cst_24 {dimension_numbers = #tpu.dot_dimension_numbers<[1], [0], [0], [1], [0, 0, 1, 1], [], []>} : vector<8x8xf32>, vector<8x8xf32>, vector<8x8xf32> -> vector<8x8xf32>
    %45 = vector.extract_strided_slice %8 {offsets = [0, 8], sizes = [8, 8], strides = [1, 1]} : vector<8x32xf32> to vector<8x8xf32>
    %46 = vector.extract_strided_slice %14 {offsets = [0, 8], sizes = [8, 8], strides = [1, 1]} : vector<8x32xf32> to vector<8x8xf32>
    %47 = vector.extract_strided_slice %15 {offsets = [0, 8], sizes = [8, 8], strides = [1, 1]} : vector<8x32xf32> to vector<8x8xf32>
    %48 = tpu.transpose %46, [1, 0] : vector<8x8xf32> -> vector<8x8xf32>
    %cst_25 = arith.constant dense<0.000000e+00> : vector<8x8xf32>
    %49 = tpu.matmul %45, %48, %cst_25 {dimension_numbers = #tpu.dot_dimension_numbers<[1], [0], [0], [1], [0, 0, 1, 1], [], []>} : vector<8x8xf32>, vector<8x8xf32>, vector<8x8xf32> -> vector<8x8xf32>
    %cst_26 = arith.constant 0.353553385 : f32
    %50 = vector.broadcast %cst_26 : f32 to vector<8x8xf32>
    %51 = arith.mulf %49, %50 : vector<8x8xf32>
    %52 = arith.addf %51, %23 : vector<8x8xf32>
    %cst_27 = arith.constant dense<0xFF800000> : vector<8xf32>
    %53 = vector.multi_reduction <maximumf>, %52, %cst_27 [1] : vector<8x8xf32> to vector<8xf32>
    %54 = vector.shape_cast %53 : vector<8xf32> to vector<8x1xf32>
    %55 = vector.broadcast %54 : vector<8x1xf32> to vector<8x8xf32>
    %56 = arith.subf %52, %55 : vector<8x8xf32>
    %57 = math.exp %56 : vector<8x8xf32>
    %cst_28 = arith.constant dense<0.000000e+00> : vector<8xf32>
    %58 = vector.multi_reduction <add>, %57, %cst_28 [1] : vector<8x8xf32> to vector<8xf32>
    %59 = vector.shape_cast %58 : vector<8xf32> to vector<8x1xf32>
    %60 = vector.broadcast %59 : vector<8x1xf32> to vector<8x8xf32>
    %61 = arith.divf %57, %60 : vector<8x8xf32>
    %c0_29 = arith.constant 0 : index
    %c1 = arith.constant 1 : index
    %c0_30 = arith.constant 0 : index
    %c0_31 = arith.constant 0 : index
    %62 = vector.load %arg13[%c0_29, %c1, %c0_30, %c0_31] : memref<1x4x8x8xf32, #tpu.memory_space<vmem>>, vector<1x1x8x8xf32>
    %63 = vector.shape_cast %62 : vector<1x1x8x8xf32> to vector<8x8xf32>
    %64 = vector.shape_cast %61 : vector<8x8xf32> to vector<1x1x8x8xf32>
    tpu.vector_store %arg13[%c0_29, %c1, %c0_30, %c0_31], %64 {strides = array<i32>} : memref<1x4x8x8xf32, #tpu.memory_space<vmem>>, vector<1x1x8x8xf32>,
    %cst_32 = arith.constant dense<0.000000e+00> : vector<8x8xf32>
    %65 = tpu.matmul %61, %47, %cst_32 {dimension_numbers = #tpu.dot_dimension_numbers<[1], [0], [0], [1], [0, 0, 1, 1], [], []>} : vector<8x8xf32>, vector<8x8xf32>, vector<8x8xf32> -> vector<8x8xf32>
    %66 = vector.extract_strided_slice %8 {offsets = [0, 16], sizes = [8, 8], strides = [1, 1]} : vector<8x32xf32> to vector<8x8xf32>
    %67 = vector.extract_strided_slice %14 {offsets = [0, 16], sizes = [8, 8], strides = [1, 1]} : vector<8x32xf32> to vector<8x8xf32>
    %68 = vector.extract_strided_slice %15 {offsets = [0, 16], sizes = [8, 8], strides = [1, 1]} : vector<8x32xf32> to vector<8x8xf32>
    %69 = tpu.transpose %67, [1, 0] : vector<8x8xf32> -> vector<8x8xf32>
    %cst_33 = arith.constant dense<0.000000e+00> : vector<8x8xf32>
    %70 = tpu.matmul %66, %69, %cst_33 {dimension_numbers = #tpu.dot_dimension_numbers<[1], [0], [0], [1], [0, 0, 1, 1], [], []>} : vector<8x8xf32>, vector<8x8xf32>, vector<8x8xf32> -> vector<8x8xf32>
    %cst_34 = arith.constant 0.353553385 : f32
    %71 = vector.broadcast %cst_34 : f32 to vector<8x8xf32>
    %72 = arith.mulf %70, %71 : vector<8x8xf32>
    %73 = arith.addf %72, %23 : vector<8x8xf32>
    %cst_35 = arith.constant dense<0xFF800000> : vector<8xf32>
    %74 = vector.multi_reduction <maximumf>, %73, %cst_35 [1] : vector<8x8xf32> to vector<8xf32>
    %75 = vector.shape_cast %74 : vector<8xf32> to vector<8x1xf32>
    %76 = vector.broadcast %75 : vector<8x1xf32> to vector<8x8xf32>
    %77 = arith.subf %73, %76 : vector<8x8xf32>
    %78 = math.exp %77 : vector<8x8xf32>
    %cst_36 = arith.constant dense<0.000000e+00> : vector<8xf32>
    %79 = vector.multi_reduction <add>, %78, %cst_36 [1] : vector<8x8xf32> to vector<8xf32>
    %80 = vector.shape_cast %79 : vector<8xf32> to vector<8x1xf32>
    %81 = vector.broadcast %80 : vector<8x1xf32> to vector<8x8xf32>
    %82 = arith.divf %78, %81 : vector<8x8xf32>
    %c0_37 = arith.constant 0 : index
    %c2 = arith.constant 2 : index
    %c0_38 = arith.constant 0 : index
    %c0_39 = arith.constant 0 : index
    %83 = vector.load %arg13[%c0_37, %c2, %c0_38, %c0_39] : memref<1x4x8x8xf32, #tpu.memory_space<vmem>>, vector<1x1x8x8xf32>
    %84 = vector.shape_cast %83 : vector<1x1x8x8xf32> to vector<8x8xf32>
    %85 = vector.shape_cast %82 : vector<8x8xf32> to vector<1x1x8x8xf32>
    tpu.vector_store %arg13[%c0_37, %c2, %c0_38, %c0_39], %85 {strides = array<i32>} : memref<1x4x8x8xf32, #tpu.memory_space<vmem>>, vector<1x1x8x8xf32>,
    %cst_40 = arith.constant dense<0.000000e+00> : vector<8x8xf32>
    %86 = tpu.matmul %82, %68, %cst_40 {dimension_numbers = #tpu.dot_dimension_numbers<[1], [0], [0], [1], [0, 0, 1, 1], [], []>} : vector<8x8xf32>, vector<8x8xf32>, vector<8x8xf32> -> vector<8x8xf32>
    %87 = vector.extract_strided_slice %8 {offsets = [0, 24], sizes = [8, 8], strides = [1, 1]} : vector<8x32xf32> to vector<8x8xf32>
    %88 = vector.extract_strided_slice %14 {offsets = [0, 24], sizes = [8, 8], strides = [1, 1]} : vector<8x32xf32> to vector<8x8xf32>
    %89 = vector.extract_strided_slice %15 {offsets = [0, 24], sizes = [8, 8], strides = [1, 1]} : vector<8x32xf32> to vector<8x8xf32>
    %90 = tpu.transpose %88, [1, 0] : vector<8x8xf32> -> vector<8x8xf32>
    %cst_41 = arith.constant dense<0.000000e+00> : vector<8x8xf32>
    %91 = tpu.matmul %87, %90, %cst_41 {dimension_numbers = #tpu.dot_dimension_numbers<[1], [0], [0], [1], [0, 0, 1, 1], [], []>} : vector<8x8xf32>, vector<8x8xf32>, vector<8x8xf32> -> vector<8x8xf32>
    %cst_42 = arith.constant 0.353553385 : f32
    %92 = vector.broadcast %cst_42 : f32 to vector<8x8xf32>
    %93 = arith.mulf %91, %92 : vector<8x8xf32>
    %94 = arith.addf %93, %23 : vector<8x8xf32>
    %cst_43 = arith.constant dense<0xFF800000> : vector<8xf32>
    %95 = vector.multi_reduction <maximumf>, %94, %cst_43 [1] : vector<8x8xf32> to vector<8xf32>
    %96 = vector.shape_cast %95 : vector<8xf32> to vector<8x1xf32>
    %97 = vector.broadcast %96 : vector<8x1xf32> to vector<8x8xf32>
    %98 = arith.subf %94, %97 : vector<8x8xf32>
    %99 = math.exp %98 : vector<8x8xf32>
    %cst_44 = arith.constant dense<0.000000e+00> : vector<8xf32>
    %100 = vector.multi_reduction <add>, %99, %cst_44 [1] : vector<8x8xf32> to vector<8xf32>
    %101 = vector.shape_cast %100 : vector<8xf32> to vector<8x1xf32>
    %102 = vector.broadcast %101 : vector<8x1xf32> to vector<8x8xf32>
    %103 = arith.divf %99, %102 : vector<8x8xf32>
    %c0_45 = arith.constant 0 : index
    %c3 = arith.constant 3 : index
    %c0_46 = arith.constant 0 : index
    %c0_47 = arith.constant 0 : index
    %104 = vector.load %arg13[%c0_45, %c3, %c0_46, %c0_47] : memref<1x4x8x8xf32, #tpu.memory_space<vmem>>, vector<1x1x8x8xf32>
    %105 = vector.shape_cast %104 : vector<1x1x8x8xf32> to vector<8x8xf32>
    %106 = vector.shape_cast %103 : vector<8x8xf32> to vector<1x1x8x8xf32>
    tpu.vector_store %arg13[%c0_45, %c3, %c0_46, %c0_47], %106 {strides = array<i32>} : memref<1x4x8x8xf32, #tpu.memory_space<vmem>>, vector<1x1x8x8xf32>,
    %cst_48 = arith.constant dense<0.000000e+00> : vector<8x8xf32>
    %107 = tpu.matmul %103, %89, %cst_48 {dimension_numbers = #tpu.dot_dimension_numbers<[1], [0], [0], [1], [0, 0, 1, 1], [], []>} : vector<8x8xf32>, vector<8x8xf32>, vector<8x8xf32> -> vector<8x8xf32>
    %108 = tpu.concatenate %44, %65, %86, %107 in 1 : vector<8x8xf32>, vector<8x8xf32>, vector<8x8xf32>, vector<8x8xf32> -> vector<8x32xf32>
    %c0_49 = arith.constant 0 : index
    %c0_50 = arith.constant 0 : index
    %109 = vector.load %arg8[%c0_49, %c0_50] : memref<32x32xf32, #tpu.memory_space<vmem>>, vector<32x32xf32>
    %cst_51 = arith.constant dense<0.000000e+00> : vector<8x32xf32>
    %110 = tpu.matmul %108, %109, %cst_51 {dimension_numbers = #tpu.dot_dimension_numbers<[1], [0], [0], [1], [0, 0, 1, 1], [], []>} : vector<8x32xf32>, vector<32x32xf32>, vector<8x32xf32> -> vector<8x32xf32>
    %c0_52 = arith.constant 0 : index
    %c0_53 = arith.constant 0 : index
    %111 = vector.load %arg9[%c0_52, %c0_53] : memref<1x32xf32, #tpu.memory_space<vmem>>, vector<1x32xf32>
    %112 = vector.broadcast %111 : vector<1x32xf32> to vector<8x32xf32>
    %113 = arith.addf %110, %112 : vector<8x32xf32>
    %114 = arith.addf %113, %1 : vector<8x32xf32>
    %c0_54 = arith.constant 0 : index
    %c0_55 = arith.constant 0 : index
    %115 = vector.load %arg10[%c0_54, %c0_55] : memref<1x32xf32, #tpu.memory_space<vmem>>, vector<1x32xf32>
    %c0_56 = arith.constant 0 : index
    %c0_57 = arith.constant 0 : index
    %116 = vector.load %arg11[%c0_56, %c0_57] : memref<1x32xf32, #tpu.memory_space<vmem>>, vector<1x32xf32>
    %cst_58 = arith.constant dense<0.000000e+00> : vector<8xf32>
    %117 = vector.multi_reduction <add>, %114, %cst_58 [1] : vector<8x32xf32> to vector<8xf32>
    %118 = vector.shape_cast %117 : vector<8xf32> to vector<8x1xf32>
    %cst_59 = arith.constant 3.200000e+01 : f32
    %119 = vector.broadcast %cst_59 : f32 to vector<8x1xf32>
    %120 = arith.divf %118, %119 : vector<8x1xf32>
    %121 = vector.broadcast %120 : vector<8x1xf32> to vector<8x32xf32>
    %122 = arith.subf %114, %121 : vector<8x32xf32>
    %123 = arith.mulf %122, %122 : vector<8x32xf32>
    %cst_60 = arith.constant dense<0.000000e+00> : vector<8xf32>
    %124 = vector.multi_reduction <add>, %123, %cst_60 [1] : vector<8x32xf32> to vector<8xf32>
    %125 = vector.shape_cast %124 : vector<8xf32> to vector<8x1xf32>
    %cst_61 = arith.constant 3.200000e+01 : f32
    %126 = vector.broadcast %cst_61 : f32 to vector<8x1xf32>
    %127 = arith.divf %125, %126 : vector<8x1xf32>
    %128 = vector.broadcast %120 : vector<8x1xf32> to vector<8x32xf32>
    %129 = arith.subf %114, %128 : vector<8x32xf32>
    %cst_62 = arith.constant 9.99999974E-6 : f32
    %130 = vector.broadcast %cst_62 : f32 to vector<8x1xf32>
    %131 = arith.addf %127, %130 : vector<8x1xf32>
    %132 = math.rsqrt %131 : vector<8x1xf32>
    %133 = vector.broadcast %132 : vector<8x1xf32> to vector<8x32xf32>
    %134 = arith.mulf %129, %133 : vector<8x32xf32>
    %135 = vector.broadcast %115 : vector<1x32xf32> to vector<8x32xf32>
    %136 = arith.mulf %134, %135 : vector<8x32xf32>
    %137 = vector.broadcast %116 : vector<1x32xf32> to vector<8x32xf32>
    %138 = arith.addf %136, %137 : vector<8x32xf32>
    %c0_63 = arith.constant 0 : index
    %c0_64 = arith.constant 0 : index
    %c0_65 = arith.constant 0 : index
    %139 = vector.load %arg12[%c0_63, %c0_64, %c0_65] : memref<1x8x32xf32, #tpu.memory_space<vmem>>, vector<1x8x32xf32>
    %140 = vector.shape_cast %139 : vector<1x8x32xf32> to vector<8x32xf32>
    %141 = vector.shape_cast %138 : vector<8x32xf32> to vector<1x8x32xf32>
    tpu.vector_store %arg12[%c0_63, %c0_64, %c0_65], %141 {strides = array<i32>} : memref<1x8x32xf32, #tpu.memory_space<vmem>>, vector<1x8x32xf32>,
    return
  }
  func.func @transform_0(%arg0: i32, %arg1: memref<2xi32, #tpu.memory_space<smem>>) -> (i32, i32, i32) {
    %c0_i32 = arith.constant 0 : i32
    %c0_i32_0 = arith.constant 0 : i32
    %c0_i32_1 = arith.constant 0 : i32
    return %arg0, %c0_i32, %c0_i32_0 : i32, i32, i32
  }
  func.func @transform_1(%arg0: i32, %arg1: memref<2xi32, #tpu.memory_space<smem>>) -> (i32, i32, i32) {
    %c0_i32 = arith.constant 0 : i32
    %c0_i32_0 = arith.constant 0 : i32
    %c0_i32_1 = arith.constant 0 : i32
    return %arg0, %c0_i32, %c0_i32_0 : i32, i32, i32
  }
  func.func @transform_2(%arg0: i32, %arg1: memref<2xi32, #tpu.memory_space<smem>>) -> (i32, i32) {
    %c0_i32 = arith.constant 0 : i32
    %c0_i32_0 = arith.constant 0 : i32
    %c0_i32_1 = arith.constant 0 : i32
    return %c0_i32, %c0_i32_0 : i32, i32
  }
  func.func @transform_3(%arg0: i32, %arg1: memref<2xi32, #tpu.memory_space<smem>>) -> (i32, i32) {
    %c0_i32 = arith.constant 0 : i32
    %c0_i32_0 = arith.constant 0 : i32
    %c0_i32_1 = arith.constant 0 : i32
    return %c0_i32, %c0_i32_0 : i32, i32
  }
  func.func @transform_4(%arg0: i32, %arg1: memref<2xi32, #tpu.memory_space<smem>>) -> (i32, i32) {
    %c0_i32 = arith.constant 0 : i32
    %c0_i32_0 = arith.constant 0 : i32
    %c0_i32_1 = arith.constant 0 : i32
    return %c0_i32, %c0_i32_0 : i32, i32
  }
  func.func @transform_5(%arg0: i32, %arg1: memref<2xi32, #tpu.memory_space<smem>>) -> (i32, i32) {
    %c0_i32 = arith.constant 0 : i32
    %c0_i32_0 = arith.constant 0 : i32
    %c0_i32_1 = arith.constant 0 : i32
    return %c0_i32, %c0_i32_0 : i32, i32
  }
  func.func @transform_6(%arg0: i32, %arg1: memref<2xi32, #tpu.memory_space<smem>>) -> (i32, i32) {
    %c0_i32 = arith.constant 0 : i32
    %c0_i32_0 = arith.constant 0 : i32
    %c0_i32_1 = arith.constant 0 : i32
    return %c0_i32, %c0_i32_0 : i32, i32
  }
  func.func @transform_7(%arg0: i32, %arg1: memref<2xi32, #tpu.memory_space<smem>>) -> (i32, i32) {
    %c0_i32 = arith.constant 0 : i32
    %c0_i32_0 = arith.constant 0 : i32
    %c0_i32_1 = arith.constant 0 : i32
    return %c0_i32, %c0_i32_0 : i32, i32
  }
  func.func @transform_8(%arg0: i32, %arg1: memref<2xi32, #tpu.memory_space<smem>>) -> (i32, i32) {
    %c0_i32 = arith.constant 0 : i32
    %c0_i32_0 = arith.constant 0 : i32
    %c0_i32_1 = arith.constant 0 : i32
    return %c0_i32, %c0_i32_0 : i32, i32
  }
  func.func @transform_9(%arg0: i32, %arg1: memref<2xi32, #tpu.memory_space<smem>>) -> (i32, i32) {
    %c0_i32 = arith.constant 0 : i32
    %c0_i32_0 = arith.constant 0 : i32
    %c0_i32_1 = arith.constant 0 : i32
    return %c0_i32, %c0_i32_0 : i32, i32
  }
  func.func @transform_10(%arg0: i32, %arg1: memref<2xi32, #tpu.memory_space<smem>>) -> (i32, i32, i32) {
    %c0_i32 = arith.constant 0 : i32
    %c0_i32_0 = arith.constant 0 : i32
    %c0_i32_1 = arith.constant 0 : i32
    return %arg0, %c0_i32, %c0_i32_0 : i32, i32, i32
  }
  func.func @transform_11(%arg0: i32, %arg1: memref<2xi32, #tpu.memory_space<smem>>) -> (i32, i32, i32, i32) {
    %c0_i32 = arith.constant 0 : i32
    %c0_i32_0 = arith.constant 0 : i32
    %c0_i32_1 = arith.constant 0 : i32
    %c0_i32_2 = arith.constant 0 : i32
    return %arg0, %c0_i32, %c0_i32_0, %c0_i32_1 : i32, i32, i32, i32
  }
}

module attributes {stable_mosaic.version = 11 : i64} {
  func.func @_mha_block_kernel(%arg0: i32, %arg1: memref<2xi32, #tpu.memory_space<smem>>, %arg2: memref<1x8x32xf32, #tpu.memory_space<vmem>>, %arg3: memref<1x8x32xf32, #tpu.memory_space<vmem>>, %arg4: memref<32x32xf32, #tpu.memory_space<vmem>>, %arg5: memref<1x32xf32, #tpu.memory_space<vmem>>, %arg6: memref<32x64xf32, #tpu.memory_space<vmem>>, %arg7: memref<1x64xf32, #tpu.memory_space<vmem>>, %arg8: memref<32x32xf32, #tpu.memory_space<vmem>>, %arg9: memref<1x32xf32, #tpu.memory_space<vmem>>, %arg10: memref<1x32xf32, #tpu.memory_space<vmem>>, %arg11: memref<1x32xf32, #tpu.memory_space<vmem>>, %arg12: memref<1x8x32xf32, #tpu.memory_space<vmem>>, %arg13: memref<1x4x8x8xf32, #tpu.memory_space<vmem>>) attributes {dimension_semantics = [#tpu.dimension_semantics<parallel>], iteration_bounds = array<i64: 2>, scalar_prefetch = 1 : i64, scratch_operands = 0 : i64, tpu.core_type = #tpu.core_type<tc>, window_params = [{transform_indices = @transform_0, window_bounds = array<i64: 1, 8, 32>}, {transform_indices = @transform_1, window_bounds = array<i64: 1, 8, 32>}, {pipeline_mode = #tpu.pipeline_mode<synchronous>, transform_indices = @transform_2, window_bounds = array<i64: 32, 32>}, {pipeline_mode = #tpu.pipeline_mode<synchronous>, transform_indices = @transform_3, window_bounds = array<i64: 1, 32>}, {pipeline_mode = #tpu.pipeline_mode<synchronous>, transform_indices = @transform_4, window_bounds = array<i64: 32, 64>}, {pipeline_mode = #tpu.pipeline_mode<synchronous>, transform_indices = @transform_5, window_bounds = array<i64: 1, 64>}, {pipeline_mode = #tpu.pipeline_mode<synchronous>, transform_indices = @transform_6, window_bounds = array<i64: 32, 32>}, {pipeline_mode = #tpu.pipeline_mode<synchronous>, transform_indices = @transform_7, window_bounds = array<i64: 1, 32>}, {pipeline_mode = #tpu.pipeline_mode<synchronous>, transform_indices = @transform_8, window_bounds = array<i64: 1, 32>}, {pipeline_mode = #tpu.pipeline_mode<synchronous>, transform_indices = @transform_9, window_bounds = array<i64: 1, 32>}, {transform_indices = @transform_10, window_bounds = array<i64: 1, 8, 32>}, {transform_indices = @transform_11, window_bounds = array<i64: 1, 4, 8, 8>}]} {
    %c0 = arith.constant 0 : index
    %c0_0 = arith.constant 0 : index
    %c0_1 = arith.constant 0 : index
    %0 = vector.load %arg2[%c0, %c0_0, %c0_1] : memref<1x8x32xf32, #tpu.memory_space<vmem>>, vector<1x8x32xf32>
    %1 = vector.shape_cast %0 : vector<1x8x32xf32> to vector<8x32xf32>
    %c0_2 = arith.constant 0 : index
    %c0_3 = arith.constant 0 : index
    %c0_4 = arith.constant 0 : index
    %2 = vector.load %arg3[%c0_2, %c0_3, %c0_4] : memref<1x8x32xf32, #tpu.memory_space<vmem>>, vector<1x8x32xf32>
    %3 = vector.shape_cast %2 : vector<1x8x32xf32> to vector<8x32xf32>
    %c0_5 = arith.constant 0 : index
    %c0_6 = arith.constant 0 : index
    %4 = vector.load %arg4[%c0_5, %c0_6] : memref<32x32xf32, #tpu.memory_space<vmem>>, vector<32x32xf32>
    %cst = arith.constant dense<0.000000e+00> : vector<8x32xf32>
    %5 = tpu.matmul %1, %4, %cst {dimension_numbers = #tpu.dot_dimension_numbers<[1], [0], [0], [1], [0, 0, 1, 1], [], []>} : vector<8x32xf32>, vector<32x32xf32>, vector<8x32xf32> -> vector<8x32xf32>
    %c0_7 = arith.constant 0 : index
    %c0_8 = arith.constant 0 : index
    %6 = vector.load %arg5[%c0_7, %c0_8] : memref<1x32xf32, #tpu.memory_space<vmem>>, vector<1x32xf32>
    %7 = vector.broadcast %6 : vector<1x32xf32> to vector<8x32xf32>
    %8 = arith.addf %5, %7 : vector<8x32xf32>
    %c0_9 = arith.constant 0 : index
    %c0_10 = arith.constant 0 : index
    %9 = vector.load %arg6[%c0_9, %c0_10] : memref<32x64xf32, #tpu.memory_space<vmem>>, vector<32x64xf32>
    %cst_11 = arith.constant dense<0.000000e+00> : vector<8x64xf32>
    %10 = tpu.matmul %3, %9, %cst_11 {dimension_numbers = #tpu.dot_dimension_numbers<[1], [0], [0], [1], [0, 0, 1, 1], [], []>} : vector<8x32xf32>, vector<32x64xf32>, vector<8x64xf32> -> vector<8x64xf32>
    %c0_12 = arith.constant 0 : index
    %c0_13 = arith.constant 0 : index
    %11 = vector.load %arg7[%c0_12, %c0_13] : memref<1x64xf32, #tpu.memory_space<vmem>>, vector<1x64xf32>
    %12 = vector.broadcast %11 : vector<1x64xf32> to vector<8x64xf32>
    %13 = arith.addf %10, %12 : vector<8x64xf32>
    %14 = vector.extract_strided_slice %13 {offsets = [0, 0], sizes = [8, 32], strides = [1, 1]} : vector<8x64xf32> to vector<8x32xf32>
    %15 = vector.extract_strided_slice %13 {offsets = [0, 32], sizes = [8, 32], strides = [1, 1]} : vector<8x64xf32> to vector<8x32xf32>
    %cst_14 = arith.constant 0.000000e+00 : f32
    %16 = vector.broadcast %cst_14 : f32 to vector<8x8xf32>
    %17 = tpu.iota {dimensions = array<i32: 1>} : vector<8x8xi32>
    %18 = tpu.iota {dimensions = array<i32: 0>} : vector<8x8xi32>
    %19 = arith.cmpi sgt, %17, %18 : vector<8x8xi32>
    %cst_15 = arith.constant -1.000000e+09 : f32
    %20 = vector.broadcast %cst_15 : f32 to vector<8x8xf32>
    %21 = arith.select %19, %20, %16 : vector<8x8xi1>, vector<8x8xf32>
    %22 = vector.extract_strided_slice %8 {offsets = [0, 0], sizes = [8, 8], strides = [1, 1]} : vector<8x32xf32> to vector<8x8xf32>
    %23 = vector.extract_strided_slice %14 {offsets = [0, 0], sizes = [8, 8], strides = [1, 1]} : vector<8x32xf32> to vector<8x8xf32>
    %24 = vector.extract_strided_slice %15 {offsets = [0, 0], sizes = [8, 8], strides = [1, 1]} : vector<8x32xf32> to vector<8x8xf32>
    %25 = tpu.transpose %23, [1, 0] : vector<8x8xf32> -> vector<8x8xf32>
    %cst_16 = arith.constant dense<0.000000e+00> : vector<8x8xf32>
    %26 = tpu.matmul %22, %25, %cst_16 {dimension_numbers = #tpu.dot_dimension_numbers<[1], [0], [0], [1], [0, 0, 1, 1], [], []>} : vector<8x8xf32>, vector<8x8xf32>, vector<8x8xf32> -> vector<8x8xf32>
    %cst_17 = arith.constant 0.353553385 : f32
    %27 = vector.broadcast %cst_17 : f32 to vector<8x8xf32>
    %28 = arith.mulf %26, %27 : vector<8x8xf32>
    %29 = arith.addf %28, %21 : vector<8x8xf32>
    %cst_18 = arith.constant dense<0xFF800000> : vector<8xf32>
    %30 = vector.multi_reduction <maximumf>, %29, %cst_18 [1] : vector<8x8xf32> to vector<8xf32>
    %31 = vector.shape_cast %30 : vector<8xf32> to vector<8x1xf32>
    %32 = vector.broadcast %31 : vector<8x1xf32> to vector<8x8xf32>
    %33 = arith.subf %29, %32 : vector<8x8xf32>
    %34 = math.exp %33 : vector<8x8xf32>
    %cst_19 = arith.constant dense<0.000000e+00> : vector<8xf32>
    %35 = vector.multi_reduction <add>, %34, %cst_19 [1] : vector<8x8xf32> to vector<8xf32>
    %36 = vector.shape_cast %35 : vector<8xf32> to vector<8x1xf32>
    %37 = vector.broadcast %36 : vector<8x1xf32> to vector<8x8xf32>
    %38 = arith.divf %34, %37 : vector<8x8xf32>
    %c0_20 = arith.constant 0 : index
    %c0_21 = arith.constant 0 : index
    %c0_22 = arith.constant 0 : index
    %c0_23 = arith.constant 0 : index
    %39 = vector.load %arg13[%c0_20, %c0_21, %c0_22, %c0_23] : memref<1x4x8x8xf32, #tpu.memory_space<vmem>>, vector<1x1x8x8xf32>
    %40 = vector.shape_cast %39 : vector<1x1x8x8xf32> to vector<8x8xf32>
    %41 = vector.shape_cast %38 : vector<8x8xf32> to vector<1x1x8x8xf32>
    tpu.vector_store %arg13[%c0_20, %c0_21, %c0_22, %c0_23], %41 {strides = array<i32>} : memref<1x4x8x8xf32, #tpu.memory_space<vmem>>, vector<1x1x8x8xf32>,
    %cst_24 = arith.constant dense<0.000000e+00> : vector<8x8xf32>
    %42 = tpu.matmul %38, %24, %cst_24 {dimension_numbers = #tpu.dot_dimension_numbers<[1], [0], [0], [1], [0, 0, 1, 1], [], []>} : vector<8x8xf32>, vector<8x8xf32>, vector<8x8xf32> -> vector<8x8xf32>
    %43 = vector.extract_strided_slice %8 {offsets = [0, 8], sizes = [8, 8], strides = [1, 1]} : vector<8x32xf32> to vector<8x8xf32>
    %44 = vector.extract_strided_slice %14 {offsets = [0, 8], sizes = [8, 8], strides = [1, 1]} : vector<8x32xf32> to vector<8x8xf32>
    %45 = vector.extract_strided_slice %15 {offsets = [0, 8], sizes = [8, 8], strides = [1, 1]} : vector<8x32xf32> to vector<8x8xf32>
    %46 = tpu.transpose %44, [1, 0] : vector<8x8xf32> -> vector<8x8xf32>
    %cst_25 = arith.constant dense<0.000000e+00> : vector<8x8xf32>
    %47 = tpu.matmul %43, %46, %cst_25 {dimension_numbers = #tpu.dot_dimension_numbers<[1], [0], [0], [1], [0, 0, 1, 1], [], []>} : vector<8x8xf32>, vector<8x8xf32>, vector<8x8xf32> -> vector<8x8xf32>
    %cst_26 = arith.constant 0.353553385 : f32
    %48 = vector.broadcast %cst_26 : f32 to vector<8x8xf32>
    %49 = arith.mulf %47, %48 : vector<8x8xf32>
    %50 = arith.addf %49, %21 : vector<8x8xf32>
    %cst_27 = arith.constant dense<0xFF800000> : vector<8xf32>
    %51 = vector.multi_reduction <maximumf>, %50, %cst_27 [1] : vector<8x8xf32> to vector<8xf32>
    %52 = vector.shape_cast %51 : vector<8xf32> to vector<8x1xf32>
    %53 = vector.broadcast %52 : vector<8x1xf32> to vector<8x8xf32>
    %54 = arith.subf %50, %53 : vector<8x8xf32>
    %55 = math.exp %54 : vector<8x8xf32>
    %cst_28 = arith.constant dense<0.000000e+00> : vector<8xf32>
    %56 = vector.multi_reduction <add>, %55, %cst_28 [1] : vector<8x8xf32> to vector<8xf32>
    %57 = vector.shape_cast %56 : vector<8xf32> to vector<8x1xf32>
    %58 = vector.broadcast %57 : vector<8x1xf32> to vector<8x8xf32>
    %59 = arith.divf %55, %58 : vector<8x8xf32>
    %c0_29 = arith.constant 0 : index
    %c1 = arith.constant 1 : index
    %c0_30 = arith.constant 0 : index
    %c0_31 = arith.constant 0 : index
    %60 = vector.load %arg13[%c0_29, %c1, %c0_30, %c0_31] : memref<1x4x8x8xf32, #tpu.memory_space<vmem>>, vector<1x1x8x8xf32>
    %61 = vector.shape_cast %60 : vector<1x1x8x8xf32> to vector<8x8xf32>
    %62 = vector.shape_cast %59 : vector<8x8xf32> to vector<1x1x8x8xf32>
    tpu.vector_store %arg13[%c0_29, %c1, %c0_30, %c0_31], %62 {strides = array<i32>} : memref<1x4x8x8xf32, #tpu.memory_space<vmem>>, vector<1x1x8x8xf32>,
    %cst_32 = arith.constant dense<0.000000e+00> : vector<8x8xf32>
    %63 = tpu.matmul %59, %45, %cst_32 {dimension_numbers = #tpu.dot_dimension_numbers<[1], [0], [0], [1], [0, 0, 1, 1], [], []>} : vector<8x8xf32>, vector<8x8xf32>, vector<8x8xf32> -> vector<8x8xf32>
    %64 = vector.extract_strided_slice %8 {offsets = [0, 16], sizes = [8, 8], strides = [1, 1]} : vector<8x32xf32> to vector<8x8xf32>
    %65 = vector.extract_strided_slice %14 {offsets = [0, 16], sizes = [8, 8], strides = [1, 1]} : vector<8x32xf32> to vector<8x8xf32>
    %66 = vector.extract_strided_slice %15 {offsets = [0, 16], sizes = [8, 8], strides = [1, 1]} : vector<8x32xf32> to vector<8x8xf32>
    %67 = tpu.transpose %65, [1, 0] : vector<8x8xf32> -> vector<8x8xf32>
    %cst_33 = arith.constant dense<0.000000e+00> : vector<8x8xf32>
    %68 = tpu.matmul %64, %67, %cst_33 {dimension_numbers = #tpu.dot_dimension_numbers<[1], [0], [0], [1], [0, 0, 1, 1], [], []>} : vector<8x8xf32>, vector<8x8xf32>, vector<8x8xf32> -> vector<8x8xf32>
    %cst_34 = arith.constant 0.353553385 : f32
    %69 = vector.broadcast %cst_34 : f32 to vector<8x8xf32>
    %70 = arith.mulf %68, %69 : vector<8x8xf32>
    %71 = arith.addf %70, %21 : vector<8x8xf32>
    %cst_35 = arith.constant dense<0xFF800000> : vector<8xf32>
    %72 = vector.multi_reduction <maximumf>, %71, %cst_35 [1] : vector<8x8xf32> to vector<8xf32>
    %73 = vector.shape_cast %72 : vector<8xf32> to vector<8x1xf32>
    %74 = vector.broadcast %73 : vector<8x1xf32> to vector<8x8xf32>
    %75 = arith.subf %71, %74 : vector<8x8xf32>
    %76 = math.exp %75 : vector<8x8xf32>
    %cst_36 = arith.constant dense<0.000000e+00> : vector<8xf32>
    %77 = vector.multi_reduction <add>, %76, %cst_36 [1] : vector<8x8xf32> to vector<8xf32>
    %78 = vector.shape_cast %77 : vector<8xf32> to vector<8x1xf32>
    %79 = vector.broadcast %78 : vector<8x1xf32> to vector<8x8xf32>
    %80 = arith.divf %76, %79 : vector<8x8xf32>
    %c0_37 = arith.constant 0 : index
    %c2 = arith.constant 2 : index
    %c0_38 = arith.constant 0 : index
    %c0_39 = arith.constant 0 : index
    %81 = vector.load %arg13[%c0_37, %c2, %c0_38, %c0_39] : memref<1x4x8x8xf32, #tpu.memory_space<vmem>>, vector<1x1x8x8xf32>
    %82 = vector.shape_cast %81 : vector<1x1x8x8xf32> to vector<8x8xf32>
    %83 = vector.shape_cast %80 : vector<8x8xf32> to vector<1x1x8x8xf32>
    tpu.vector_store %arg13[%c0_37, %c2, %c0_38, %c0_39], %83 {strides = array<i32>} : memref<1x4x8x8xf32, #tpu.memory_space<vmem>>, vector<1x1x8x8xf32>,
    %cst_40 = arith.constant dense<0.000000e+00> : vector<8x8xf32>
    %84 = tpu.matmul %80, %66, %cst_40 {dimension_numbers = #tpu.dot_dimension_numbers<[1], [0], [0], [1], [0, 0, 1, 1], [], []>} : vector<8x8xf32>, vector<8x8xf32>, vector<8x8xf32> -> vector<8x8xf32>
    %85 = vector.extract_strided_slice %8 {offsets = [0, 24], sizes = [8, 8], strides = [1, 1]} : vector<8x32xf32> to vector<8x8xf32>
    %86 = vector.extract_strided_slice %14 {offsets = [0, 24], sizes = [8, 8], strides = [1, 1]} : vector<8x32xf32> to vector<8x8xf32>
    %87 = vector.extract_strided_slice %15 {offsets = [0, 24], sizes = [8, 8], strides = [1, 1]} : vector<8x32xf32> to vector<8x8xf32>
    %88 = tpu.transpose %86, [1, 0] : vector<8x8xf32> -> vector<8x8xf32>
    %cst_41 = arith.constant dense<0.000000e+00> : vector<8x8xf32>
    %89 = tpu.matmul %85, %88, %cst_41 {dimension_numbers = #tpu.dot_dimension_numbers<[1], [0], [0], [1], [0, 0, 1, 1], [], []>} : vector<8x8xf32>, vector<8x8xf32>, vector<8x8xf32> -> vector<8x8xf32>
    %cst_42 = arith.constant 0.353553385 : f32
    %90 = vector.broadcast %cst_42 : f32 to vector<8x8xf32>
    %91 = arith.mulf %89, %90 : vector<8x8xf32>
    %92 = arith.addf %91, %21 : vector<8x8xf32>
    %cst_43 = arith.constant dense<0xFF800000> : vector<8xf32>
    %93 = vector.multi_reduction <maximumf>, %92, %cst_43 [1] : vector<8x8xf32> to vector<8xf32>
    %94 = vector.shape_cast %93 : vector<8xf32> to vector<8x1xf32>
    %95 = vector.broadcast %94 : vector<8x1xf32> to vector<8x8xf32>
    %96 = arith.subf %92, %95 : vector<8x8xf32>
    %97 = math.exp %96 : vector<8x8xf32>
    %cst_44 = arith.constant dense<0.000000e+00> : vector<8xf32>
    %98 = vector.multi_reduction <add>, %97, %cst_44 [1] : vector<8x8xf32> to vector<8xf32>
    %99 = vector.shape_cast %98 : vector<8xf32> to vector<8x1xf32>
    %100 = vector.broadcast %99 : vector<8x1xf32> to vector<8x8xf32>
    %101 = arith.divf %97, %100 : vector<8x8xf32>
    %c0_45 = arith.constant 0 : index
    %c3 = arith.constant 3 : index
    %c0_46 = arith.constant 0 : index
    %c0_47 = arith.constant 0 : index
    %102 = vector.load %arg13[%c0_45, %c3, %c0_46, %c0_47] : memref<1x4x8x8xf32, #tpu.memory_space<vmem>>, vector<1x1x8x8xf32>
    %103 = vector.shape_cast %102 : vector<1x1x8x8xf32> to vector<8x8xf32>
    %104 = vector.shape_cast %101 : vector<8x8xf32> to vector<1x1x8x8xf32>
    tpu.vector_store %arg13[%c0_45, %c3, %c0_46, %c0_47], %104 {strides = array<i32>} : memref<1x4x8x8xf32, #tpu.memory_space<vmem>>, vector<1x1x8x8xf32>,
    %cst_48 = arith.constant dense<0.000000e+00> : vector<8x8xf32>
    %105 = tpu.matmul %101, %87, %cst_48 {dimension_numbers = #tpu.dot_dimension_numbers<[1], [0], [0], [1], [0, 0, 1, 1], [], []>} : vector<8x8xf32>, vector<8x8xf32>, vector<8x8xf32> -> vector<8x8xf32>
    %106 = tpu.concatenate %42, %63, %84, %105 in 1 : vector<8x8xf32>, vector<8x8xf32>, vector<8x8xf32>, vector<8x8xf32> -> vector<8x32xf32>
    %c0_49 = arith.constant 0 : index
    %c0_50 = arith.constant 0 : index
    %107 = vector.load %arg8[%c0_49, %c0_50] : memref<32x32xf32, #tpu.memory_space<vmem>>, vector<32x32xf32>
    %cst_51 = arith.constant dense<0.000000e+00> : vector<8x32xf32>
    %108 = tpu.matmul %106, %107, %cst_51 {dimension_numbers = #tpu.dot_dimension_numbers<[1], [0], [0], [1], [0, 0, 1, 1], [], []>} : vector<8x32xf32>, vector<32x32xf32>, vector<8x32xf32> -> vector<8x32xf32>
    %c0_52 = arith.constant 0 : index
    %c0_53 = arith.constant 0 : index
    %109 = vector.load %arg9[%c0_52, %c0_53] : memref<1x32xf32, #tpu.memory_space<vmem>>, vector<1x32xf32>
    %110 = vector.broadcast %109 : vector<1x32xf32> to vector<8x32xf32>
    %111 = arith.addf %108, %110 : vector<8x32xf32>
    %112 = arith.addf %111, %1 : vector<8x32xf32>
    %c0_54 = arith.constant 0 : index
    %c0_55 = arith.constant 0 : index
    %113 = vector.load %arg10[%c0_54, %c0_55] : memref<1x32xf32, #tpu.memory_space<vmem>>, vector<1x32xf32>
    %c0_56 = arith.constant 0 : index
    %c0_57 = arith.constant 0 : index
    %114 = vector.load %arg11[%c0_56, %c0_57] : memref<1x32xf32, #tpu.memory_space<vmem>>, vector<1x32xf32>
    %cst_58 = arith.constant dense<0.000000e+00> : vector<8xf32>
    %115 = vector.multi_reduction <add>, %112, %cst_58 [1] : vector<8x32xf32> to vector<8xf32>
    %116 = vector.shape_cast %115 : vector<8xf32> to vector<8x1xf32>
    %cst_59 = arith.constant 3.200000e+01 : f32
    %117 = vector.broadcast %cst_59 : f32 to vector<8x1xf32>
    %118 = arith.divf %116, %117 : vector<8x1xf32>
    %119 = vector.broadcast %118 : vector<8x1xf32> to vector<8x32xf32>
    %120 = arith.subf %112, %119 : vector<8x32xf32>
    %121 = arith.mulf %120, %120 : vector<8x32xf32>
    %cst_60 = arith.constant dense<0.000000e+00> : vector<8xf32>
    %122 = vector.multi_reduction <add>, %121, %cst_60 [1] : vector<8x32xf32> to vector<8xf32>
    %123 = vector.shape_cast %122 : vector<8xf32> to vector<8x1xf32>
    %cst_61 = arith.constant 3.200000e+01 : f32
    %124 = vector.broadcast %cst_61 : f32 to vector<8x1xf32>
    %125 = arith.divf %123, %124 : vector<8x1xf32>
    %126 = vector.broadcast %118 : vector<8x1xf32> to vector<8x32xf32>
    %127 = arith.subf %112, %126 : vector<8x32xf32>
    %cst_62 = arith.constant 9.99999974E-6 : f32
    %128 = vector.broadcast %cst_62 : f32 to vector<8x1xf32>
    %129 = arith.addf %125, %128 : vector<8x1xf32>
    %130 = math.rsqrt %129 : vector<8x1xf32>
    %131 = vector.broadcast %130 : vector<8x1xf32> to vector<8x32xf32>
    %132 = arith.mulf %127, %131 : vector<8x32xf32>
    %133 = vector.broadcast %113 : vector<1x32xf32> to vector<8x32xf32>
    %134 = arith.mulf %132, %133 : vector<8x32xf32>
    %135 = vector.broadcast %114 : vector<1x32xf32> to vector<8x32xf32>
    %136 = arith.addf %134, %135 : vector<8x32xf32>
    %c0_63 = arith.constant 0 : index
    %c0_64 = arith.constant 0 : index
    %c0_65 = arith.constant 0 : index
    %137 = vector.load %arg12[%c0_63, %c0_64, %c0_65] : memref<1x8x32xf32, #tpu.memory_space<vmem>>, vector<1x8x32xf32>
    %138 = vector.shape_cast %137 : vector<1x8x32xf32> to vector<8x32xf32>
    %139 = vector.shape_cast %136 : vector<8x32xf32> to vector<1x8x32xf32>
    tpu.vector_store %arg12[%c0_63, %c0_64, %c0_65], %139 {strides = array<i32>} : memref<1x8x32xf32, #tpu.memory_space<vmem>>, vector<1x8x32xf32>,
    return
  }
  func.func @transform_0(%arg0: i32, %arg1: memref<2xi32, #tpu.memory_space<smem>>) -> (i32, i32, i32) {
    %c0_i32 = arith.constant 0 : i32
    %c0_i32_0 = arith.constant 0 : i32
    %c0_i32_1 = arith.constant 0 : i32
    return %arg0, %c0_i32, %c0_i32_0 : i32, i32, i32
  }
  func.func @transform_1(%arg0: i32, %arg1: memref<2xi32, #tpu.memory_space<smem>>) -> (i32, i32, i32) {
    %c0_i32 = arith.constant 0 : i32
    %c0_i32_0 = arith.constant 0 : i32
    %c0_i32_1 = arith.constant 0 : i32
    return %arg0, %c0_i32, %c0_i32_0 : i32, i32, i32
  }
  func.func @transform_2(%arg0: i32, %arg1: memref<2xi32, #tpu.memory_space<smem>>) -> (i32, i32) {
    %c0_i32 = arith.constant 0 : i32
    %c0_i32_0 = arith.constant 0 : i32
    %c0_i32_1 = arith.constant 0 : i32
    return %c0_i32, %c0_i32_0 : i32, i32
  }
  func.func @transform_3(%arg0: i32, %arg1: memref<2xi32, #tpu.memory_space<smem>>) -> (i32, i32) {
    %c0_i32 = arith.constant 0 : i32
    %c0_i32_0 = arith.constant 0 : i32
    %c0_i32_1 = arith.constant 0 : i32
    return %c0_i32, %c0_i32_0 : i32, i32
  }
  func.func @transform_4(%arg0: i32, %arg1: memref<2xi32, #tpu.memory_space<smem>>) -> (i32, i32) {
    %c0_i32 = arith.constant 0 : i32
    %c0_i32_0 = arith.constant 0 : i32
    %c0_i32_1 = arith.constant 0 : i32
    return %c0_i32, %c0_i32_0 : i32, i32
  }
  func.func @transform_5(%arg0: i32, %arg1: memref<2xi32, #tpu.memory_space<smem>>) -> (i32, i32) {
    %c0_i32 = arith.constant 0 : i32
    %c0_i32_0 = arith.constant 0 : i32
    %c0_i32_1 = arith.constant 0 : i32
    return %c0_i32, %c0_i32_0 : i32, i32
  }
  func.func @transform_6(%arg0: i32, %arg1: memref<2xi32, #tpu.memory_space<smem>>) -> (i32, i32) {
    %c0_i32 = arith.constant 0 : i32
    %c0_i32_0 = arith.constant 0 : i32
    %c0_i32_1 = arith.constant 0 : i32
    return %c0_i32, %c0_i32_0 : i32, i32
  }
  func.func @transform_7(%arg0: i32, %arg1: memref<2xi32, #tpu.memory_space<smem>>) -> (i32, i32) {
    %c0_i32 = arith.constant 0 : i32
    %c0_i32_0 = arith.constant 0 : i32
    %c0_i32_1 = arith.constant 0 : i32
    return %c0_i32, %c0_i32_0 : i32, i32
  }
  func.func @transform_8(%arg0: i32, %arg1: memref<2xi32, #tpu.memory_space<smem>>) -> (i32, i32) {
    %c0_i32 = arith.constant 0 : i32
    %c0_i32_0 = arith.constant 0 : i32
    %c0_i32_1 = arith.constant 0 : i32
    return %c0_i32, %c0_i32_0 : i32, i32
  }
  func.func @transform_9(%arg0: i32, %arg1: memref<2xi32, #tpu.memory_space<smem>>) -> (i32, i32) {
    %c0_i32 = arith.constant 0 : i32
    %c0_i32_0 = arith.constant 0 : i32
    %c0_i32_1 = arith.constant 0 : i32
    return %c0_i32, %c0_i32_0 : i32, i32
  }
  func.func @transform_10(%arg0: i32, %arg1: memref<2xi32, #tpu.memory_space<smem>>) -> (i32, i32, i32) {
    %c0_i32 = arith.constant 0 : i32
    %c0_i32_0 = arith.constant 0 : i32
    %c0_i32_1 = arith.constant 0 : i32
    return %arg0, %c0_i32, %c0_i32_0 : i32, i32, i32
  }
  func.func @transform_11(%arg0: i32, %arg1: memref<2xi32, #tpu.memory_space<smem>>) -> (i32, i32, i32, i32) {
    %c0_i32 = arith.constant 0 : i32
    %c0_i32_0 = arith.constant 0 : i32
    %c0_i32_1 = arith.constant 0 : i32
    %c0_i32_2 = arith.constant 0 : i32
    return %arg0, %c0_i32, %c0_i32_0, %c0_i32_1 : i32, i32, i32, i32
  }
}

module attributes {stable_mosaic.version = 11 : i64} {
  func.func @_head_kernel(%arg0: i32, %arg1: memref<16x32xf32, #tpu.memory_space<vmem>>, %arg2: memref<32x16xf32, #tpu.memory_space<vmem>>, %arg3: memref<1x16xf32, #tpu.memory_space<vmem>>, %arg4: memref<16x16xf32, #tpu.memory_space<vmem>>) attributes {dimension_semantics = [#tpu.dimension_semantics<parallel>], iteration_bounds = array<i64: 1>, scalar_prefetch = 0 : i64, scratch_operands = 0 : i64, tpu.core_type = #tpu.core_type<tc>, window_params = [{transform_indices = @transform_0, window_bounds = array<i64: 16, 32>}, {pipeline_mode = #tpu.pipeline_mode<synchronous>, transform_indices = @transform_1, window_bounds = array<i64: 32, 16>}, {pipeline_mode = #tpu.pipeline_mode<synchronous>, transform_indices = @transform_2, window_bounds = array<i64: 1, 16>}, {transform_indices = @transform_3, window_bounds = array<i64: 16, 16>}]} {
    %c0 = arith.constant 0 : index
    %c0_0 = arith.constant 0 : index
    %0 = vector.load %arg1[%c0, %c0_0] : memref<16x32xf32, #tpu.memory_space<vmem>>, vector<16x32xf32>
    %c0_1 = arith.constant 0 : index
    %c0_2 = arith.constant 0 : index
    %1 = vector.load %arg2[%c0_1, %c0_2] : memref<32x16xf32, #tpu.memory_space<vmem>>, vector<32x16xf32>
    %cst = arith.constant dense<0.000000e+00> : vector<16x16xf32>
    %2 = tpu.matmul %0, %1, %cst {dimension_numbers = #tpu.dot_dimension_numbers<[1], [0], [0], [1], [0, 0, 1, 1], [], []>} : vector<16x32xf32>, vector<32x16xf32>, vector<16x16xf32> -> vector<16x16xf32>
    %c0_3 = arith.constant 0 : index
    %c0_4 = arith.constant 0 : index
    %3 = vector.load %arg3[%c0_3, %c0_4] : memref<1x16xf32, #tpu.memory_space<vmem>>, vector<1x16xf32>
    %4 = vector.broadcast %3 : vector<1x16xf32> to vector<16x16xf32>
    %5 = arith.addf %2, %4 : vector<16x16xf32>
    %cst_5 = arith.constant dense<0xFF800000> : vector<16xf32>
    %6 = vector.multi_reduction <maximumf>, %5, %cst_5 [1] : vector<16x16xf32> to vector<16xf32>
    %7 = vector.shape_cast %6 : vector<16xf32> to vector<16x1xf32>
    %8 = vector.broadcast %7 : vector<16x1xf32> to vector<16x16xf32>
    %9 = arith.subf %5, %8 : vector<16x16xf32>
    %10 = math.exp %9 : vector<16x16xf32>
    %cst_6 = arith.constant dense<0.000000e+00> : vector<16xf32>
    %11 = vector.multi_reduction <add>, %10, %cst_6 [1] : vector<16x16xf32> to vector<16xf32>
    %12 = vector.shape_cast %11 : vector<16xf32> to vector<16x1xf32>
    %13 = math.log %12 : vector<16x1xf32>
    %14 = vector.broadcast %13 : vector<16x1xf32> to vector<16x16xf32>
    %15 = arith.subf %9, %14 : vector<16x16xf32>
    %c0_7 = arith.constant 0 : index
    %c0_8 = arith.constant 0 : index
    %16 = vector.load %arg4[%c0_7, %c0_8] : memref<16x16xf32, #tpu.memory_space<vmem>>, vector<16x16xf32>
    tpu.vector_store %arg4[%c0_7, %c0_8], %15 {strides = array<i32>} : memref<16x16xf32, #tpu.memory_space<vmem>>, vector<16x16xf32>,
    return
  }
  func.func @transform_0(%arg0: i32) -> (i32, i32) {
    %c0_i32 = arith.constant 0 : i32
    %c0_i32_0 = arith.constant 0 : i32
    return %arg0, %c0_i32 : i32, i32
  }
  func.func @transform_1(%arg0: i32) -> (i32, i32) {
    %c0_i32 = arith.constant 0 : i32
    %c0_i32_0 = arith.constant 0 : i32
    %c0_i32_1 = arith.constant 0 : i32
    return %c0_i32, %c0_i32_0 : i32, i32
  }
  func.func @transform_2(%arg0: i32) -> (i32, i32) {
    %c0_i32 = arith.constant 0 : i32
    %c0_i32_0 = arith.constant 0 : i32
    %c0_i32_1 = arith.constant 0 : i32
    return %c0_i32, %c0_i32_0 : i32, i32
  }
  func.func @transform_3(%arg0: i32) -> (i32, i32) {
    %c0_i32 = arith.constant 0 : i32
    %c0_i32_0 = arith.constant 0 : i32
    return %arg0, %c0_i32 : i32, i32
  }
}

</mosaic_0001>

<bundles_post_ra>
// kernel: speech_transformer_forward.10
= control target key start
LH: loop header
LB: loop body
LE: loop exit
PB: predicated region body
PF: predicated region fallthrough
CT: control target
= control target key end

     0   :  { %vm39_vm0 = vcmask 261120   ;;  %vm138_vm1 = vcmask 523264   ;;  %s463_s1 = inlined_call_operand.vmem [shape: f32[32,64], index: 1, kind: input, shape index: {}]   ;;  %s464_s0 = inlined_call_operand.vmem [shape: f32[16,32], index: 0, kind: input, shape index: {}]   ;;  %s465_s3 = inlined_call_operand.vmem [shape: f32[64,32], index: 3, kind: input, shape index: {}]   ;;  %s466_s2 = inlined_call_operand.vmem [shape: f32[1,64], index: 2, kind: input, shape index: {}]   ;;  %s467_s4 = inlined_call_operand.vmem [shape: f32[1,32], index: 4, kind: input, shape index: {}]   ;;  %s468_s5 = inlined_call_operand.vmem [shape: f32[1,32], index: 5, kind: input, shape index: {}]   ;;  %s469_s6 = inlined_call_operand.vmem [shape: f32[1,32], index: 6, kind: input, shape index: {}]   ;;  %s470_s7 = inlined_call_operand.vmem [shape: f32[16,32], index: 7, kind: output, shape index: {}]  }
   0x1   :  { %v28_v0 = vld [vmem:[%s463_s1] sm:$0xff]  ;;  %v29_v1 = vld [vmem:[%s463_s1 + $0x8] sm:$0xff]  ;;  %v30_v2 = vld [vmem:[%s463_s1 + $0x10] sm:$0xff] }
   0x2   :  { %v327_v3 = vpack.c.bf16 %v29_v1, %v28_v0  ;;  %v31_v4 = vld [vmem:[%s463_s1 + $0x18] sm:$0xff]  ;;  %v26_v5 = vld [vmem:[%s464_s0] sm:$0xff]  ;;  %v124_v8 = vld [vmem:[%s465_s3 + $0x8] sm:$0xff] }
   0x3   :  { %v331_v6 = vpack.c.bf16 %v31_v4, %v30_v2  ;;  %305 = vmatprep.mubr.msk.f32.mxu0 %vm39_vm0, %v26_v5  ;;  %v123_v7 = vld [vmem:[%s465_s3] sm:$0xff]  ;;  %v125_v9 = vld [vmem:[%s465_s3 + $0x10] sm:$0xff]  ;;  %v126_v11 = vld [vmem:[%s465_s3 + $0x18] sm:$0xff] }
   0x4   :  { %328 = vmatprep.subr.bf16.mxu0 %v327_v3  ;;  %v335_v10 = vpack.c.bf16 %v124_v8, %v123_v7  ;;  %v339_v12 = vpack.c.bf16 %v126_v11, %v125_v9  ;;  %v127_v13 = vld [vmem:[%s465_s3 + $0x20] sm:$0xff]  ;;  %v128_v14 = vld [vmem:[%s465_s3 + $0x28] sm:$0xff]  ;;  %v129_v17 = vld [vmem:[%s465_s3 + $0x30] sm:$0xff] }
   0x5   :  { %330 = vmatpush3.bf16.msra.mxu0 %v327_v3  ;;  %v343_v15 = vpack.c.bf16 %v128_v14, %v127_v13  ;;  %v27_v16 = vld [vmem:[%s464_s0 + $0x8] sm:$0xff]  ;;  %v130_v18 = vld [vmem:[%s465_s3 + $0x38] sm:$0xff]  ;;  %v273_v20 = vld [vmem:[%s466_s2] ss:$0 sm:$0xff] }
   0x6   :  { %332 = vmatprep.subr.bf16.mxu0 %v331_v6  ;;  %336 = vmatprep.subr.bf16.mxu1 %v335_v10  ;;  %v347_v19 = vpack.c.bf16 %v130_v18, %v129_v17  ;;  %v276_v27 = vld [vmem:[%s467_s4] ss:$0 sm:$0xff] }
   0x7   :  { %338 = vmatpush3.bf16.msra.mxu1 %v335_v10  ;;  %v279_v53 = vld [vmem:[%s468_s5] ss:$0 sm:$0xff] }
   0x8   :  { %340 = vmatprep.subr.bf16.mxu1 %v339_v12  ;;  %v280_v55 = vld [vmem:[%s469_s6] ss:$0 sm:$0xff] }
   0x9   :  { %334 = vmatpush3.bf16.msra.mxu0 %v331_v6 }
   0xb   :  { %342 = vmatpush3.bf16.msra.mxu1 %v339_v12 }
   0xc   :  { %306 = vmatmul.mubr.msk.f32.vlgmr.msra.gmra.mrb[0].mxu0 %vm39_vm0, %v27_v16  ;;  %344 = vmatprep.subr.bf16.mxu1 %v343_v15 }
   0xf   :  { %346 = vmatpush3.bf16.msra.mxu1 %v343_v15 }
  0x10   :  { %348 = vmatprep.subr.bf16.mxu1 %v347_v19 }
  0x13   :  { %350 = vmatpush3.bf16.msra.mxu1 %v347_v19 }
  0xdf   :  { %v307_v21 = vpop.f32.mrb[0].mxu0 }
  0xe0   :  { %v118_v22 = vadd.f32 %v307_v21, %v273_v20  ;;  %v112_v23 = vpop.f32.mrb[1].mxu0 }
  0xe1   :  { %v113_v24 = vadd.f32 %v273_v20, %v112_v23 }
  0xe2   :  { %v122_v26 = vmax.f32 %v118_v22, 0.0 }
  0xe3   :  { %v121_v25 = vmax.f32 %v113_v24, 0.0 }
  0xe5   :  { %324 = vmatprep.mubr.msk.f32.mxu1 %vm138_vm1, %v121_v25 }
  0xe6   :  { %325 = vmatmul.mubr.msk.f32.vlgmr.msra.gmra.mrb[0].mxu1 %vm138_vm1, %v122_v26 }
 0x1b9   :  { %v326_v28 = vpop.f32.mrb[0].mxu1 }
 0x1ba   :  { %v211_v29 = vpop.f32.mrb[1].mxu1  ;;  %v217_v30 = vadd.f32 %v326_v28, %v276_v27 }
 0x1bb   :  { %v212_v31 = vadd.f32 %v276_v27, %v211_v29 }
 0x1bc   :  { %v221_v34 = vadd.f32 %v217_v30, %v27_v16 }
 0x1bd   :  { %v220_v32 = vadd.f32 %v212_v31, %v26_v5 }
 0x1be   :  { %v227_v35 = vsel %vm39_vm0, %v221_v34, 0.0 }
 0x1bf   :  { %v224_v33 = vsel %vm39_vm0, %v220_v32, 0.0 }
 0x1c0   :  { %225 = vadd.xlane.f32.xlu0 %v224_v33 }
 0x1c4   :  { %228 = vadd.xlane.f32.xlu0 %v227_v35 }
 0x24d   :  { %v226_v36 = vpop.xlane.xlu0 %225 }
 0x24e   :  { %v231_v37 = vmul.f32 0.03125, %v226_v36 }
 0x250   :  { %v233_v38 = vsub.f32 %v220_v32, %v231_v37 }
 0x251   :  { %v229_v39 = vpop.xlane.xlu0 %228 }
 0x252   :  { %v232_v40 = vmul.f32 0.03125, %v229_v39  ;;  %v235_v41 = vmul.f32 %v233_v38, %v233_v38 }
 0x254   :  { %v234_v42 = vsub.f32 %v221_v34, %v232_v40  ;;  %v237_v43 = vsel %vm39_vm0, %v235_v41, 0.0 }
 0x255   :  { %238 = vadd.xlane.f32.xlu1 %v237_v43 }
 0x256   :  { %v236_v44 = vmul.f32 %v234_v42, %v234_v42 }
 0x258   :  { %v240_v45 = vsel %vm39_vm0, %v236_v44, 0.0 }
 0x259   :  { %241 = vadd.xlane.f32.xlu1 %v240_v45 }
 0x2e2   :  { %v239_v46 = vpop.xlane.xlu1 %238 }
 0x2e3   :  { %v243_v47 = vmul.f32 0.03125, %v239_v46 }
 0x2e5   :  { %v245_v48 = vadd.f32 1e-05, %v243_v47 }
 0x2e6   :  { %v242_v49 = vpop.xlane.xlu1 %241 }
 0x2e7   :  { %351 = vrsqrt.f32 %v245_v48  ;;  %v244_v50 = vmul.f32 0.03125, %v242_v49 }
 0x2e9   :  { %v246_v51 = vadd.f32 1e-05, %v244_v50 }
 0x2eb   :  { %353 = vrsqrt.f32 %v246_v51 }
 0x2f1   :  { %v352_v52 = vpop.eup %351 }
 0x2f2   :  { %v249_v54 = vmul.f32 %v352_v52, %v233_v38 }
 0x2f4   :  { %v257_v56 = vmul.f32 %v279_v53, %v249_v54 }
 0x2f5   :  { %v354_v57 = vpop.eup %353 }
 0x2f6   :  { %v265_v58 = vadd.f32 %v280_v55, %v257_v56  ;;  %v250_v59 = vmul.f32 %v354_v57, %v234_v42 }
 0x2f8   :  { %267 = vst.msk [vmem:[%s470_s7] sm:$0xff] %vm39_vm0, %v265_v58  ;;  %v258_v60 = vmul.f32 %v279_v53, %v250_v59 }
 0x2fa   :  { %v266_v61 = vadd.f32 %v280_v55, %v258_v60 }
 0x2fc   :  { %268 = vst.msk [vmem:[%s470_s7 + $0x8] sm:$0xff] %vm39_vm0, %v266_v61 }

// kernel: speech_transformer_forward.8
= control target key start
LH: loop header
LB: loop body
LE: loop exit
PB: predicated region body
PF: predicated region fallthrough
CT: control target
= control target key end

     0   :  { %s503_s21 = smov 0   ;;  %s548_s0 = inlined_call_operand.vmem [shape: f32[2,8,16], index: 0, kind: input, shape index: {}]   ;;  %s549_s1 = inlined_call_operand.vmem [shape: f32[16,32], index: 1, kind: input, shape index: {}]   ;;  %s550_s2 = inlined_call_operand.vmem [shape: f32[1,32], index: 2, kind: input, shape index: {}]   ;;  %s551_s3 = inlined_call_operand.vmem [shape: f32[1,32], index: 3, kind: input, shape index: {}]   ;;  %s552_s4 = inlined_call_operand.vmem [shape: f32[1,32], index: 4, kind: input, shape index: {}]   ;;  %s553_s5 = inlined_call_operand.vmem [shape: f32[8,32], index: 5, kind: input, shape index: {}]   ;;  %s554_s6 = inlined_call_operand.vmem [shape: f32[2,8,32], index: 6, kind: output, shape index: {}]  }
   0x1 LB: > { %s418_s22 = sadd.s32 4294967295, %s463_s21   ;;  %p422_p0 = scmp.ge.s32.totalorder %s463_s21, 1  ;;  %s463_s21 = sphi %s503_s21, %s16_s21  }
   0x2   : > { %p211_p1 = scmp.lt.s32.totalorder %s463_s21, 3 }
   0x4   : > { %p212_p2 = pnand %p422_p0, %p211_p1 }
   0x5   : > { %v248_v0 = vld [vmem:[%s549_s1] sm:$0xff] (!%p212_p2)  ;;  %v249_v1 = vld [vmem:[%s549_s1 + $0x8] sm:$0xff] (!%p212_p2)  ;;  %p239_p3 = scmp.lt.s32.totalorder (!%p212_p2), %s418_s22, 1  ;;  %v465_v2 = vmov (!%p212_p2), 0.0|0.0   ;;  %vm466_vm0 = vmmov (!%p212_p2), 0   ;;  %v467_v4 = vmov (!%p212_p2), 0.0  }
   0x6   : > { %215 = sbr.rel (%p212_p2) target bundleno = 547 (0x223), region = 44  ;;  %441 = vmatprep.subr.bf16.mxu0 (!%p212_p2), %v465_v2  ;;  %v442_v3 = vpack.c.bf16 (!%p212_p2), %v249_v1, %v248_v0  ;;  %438 = vmatprep.mubr.msk.f32.mxu0 (!%p212_p2), %vm466_vm0, %v467_v4  ;;  %vm257_vm1 = vcmask (!%p212_p2), 130048   ;;  %v425_v6 = vld [vmem:[%s550_s2] ss:$0 sm:$0xff] (!%p212_p2)  ;;  %vm333_vm2 = vcmask (!%p212_p2), 261120  }
   0x7   : > { %v427_v20 = vld [vmem:[%s551_s3] ss:$0 sm:$0xff] (!%p212_p2) }
   0x8   : > { %443 = vmatpush3.bf16.msra.mxu0 (!%p212_p2), %v442_v3  ;;  %v428_v22 = vld [vmem:[%s552_s4] ss:$0 sm:$0xff] (!%p212_p2) }
   0x9   : > { %v362_v24 = vld [vmem:[%s553_s5] sm:$0xff] (!%p212_p2) }
   0xd   : > { %s556_s22 = smov (!%p239_p3, %s418_s22), 1 }
   0xe   : > { %s423_s27 = sshll.u32 %s556_s22, 3 }
   0xf   : > { %s242_s30 = scalar_lea.vmem %s548_s0, %s423_s27  ;;  %s246_s17 = scalar_lea.vmem %s554_s6, %s423_s27 }
  0x10   : > { %v247_v5 = vld [vmem:[%s242_s30] sm:$0xff] }
  0x11   : > { %439 = vmatmul.mubr.msk.f32.vlgmr.msra.gmra.mrb[0].mxu0 %vm257_vm1, %v247_v5 }
  0xe4   : > { %v327_v7 = vpop.f32.mrb[0].mxu0 }
  0xe5   : > { %v328_v8 = vadd.f32 %v425_v6, %v327_v7  ;;  %v440_v9 = vpop.f32.mrb[1].mxu0 }
  0xe7   : > { %v334_v10 = vsel %vm333_vm2, %v328_v8, 0.0 }
  0xe8   : > { %335 = vadd.xlane.f32.xlu0 %v334_v10 }
 0x175   : > { %v336_v11 = vpop.xlane.xlu0 %335 }
 0x176   : > { %v338_v12 = vmul.f32 0.03125, %v336_v11 }
 0x178   : > { %v339_v13 = vsub.f32 %v328_v8, %v338_v12 }
 0x17a   : > { %v340_v14 = vmul.f32 %v339_v13, %v339_v13 }
 0x17c   : > { %v341_v15 = vsel %vm333_vm2, %v340_v14, 0.0 }
 0x17d   : > { %342 = vadd.xlane.f32.xlu0 %v341_v15 }
 0x20a   : > { %v343_v16 = vpop.xlane.xlu0 %342 }
 0x20b   : > { %v344_v17 = vmul.f32 0.03125, %v343_v16 }
 0x20d   : > { %v345_v18 = vadd.f32 1e-05, %v344_v17 }
 0x20f   : > { %455 = vrsqrt.f32 %v345_v18 }
 0x219   : > { %v456_v19 = vpop.eup %455 }
 0x21a   : > { %v347_v21 = vmul.f32 %v456_v19, %v339_v13 }
 0x21c   : > { %v354_v23 = vmul.f32 %v427_v20, %v347_v21 }
 0x21e   : > { %v361_v25 = vadd.f32 %v428_v22, %v354_v23 }
 0x220   : > { %v363_v26 = vadd.f32 %v362_v24, %v361_v25 }
 0x222   : > { %364 = vst.msk [vmem:[%s246_s17] sm:$0xff] %vm333_vm2, %v363_v26 }
 0x223 PF: > { %s16_s21 = sadd.s32 1, %s463_s21  }
 0x224   : > { %p13_p4 = scmp.ge.s32.totalorder %s16_s21, 4  }
 0x226   :  { %15 = sbr.rel (!%p13_p4) target bundleno = 1 (0x1), region = 74 }

// kernel: speech_transformer_forward.9
= control target key start
LH: loop header
LB: loop body
LE: loop exit
PB: predicated region body
PF: predicated region fallthrough
CT: control target
= control target key end

     0   :  { %s2174_s0 = inlined_call_operand.vmem [shape: s32[2], index: 0, kind: input, shape index: {}]   ;;  %s2175_s1 = inlined_call_operand.vmem [shape: f32[2,8,32], index: 1, kind: input, shape index: {}, may-alias: {1,2}]   ;;  %s2176_s2 = inlined_call_operand.vmem [shape: f32[2,8,32], index: 2, kind: input, shape index: {}, may-alias: {1,2}]   ;;  %s2177_s3 = inlined_call_operand.vmem [shape: f32[32,32], index: 3, kind: input, shape index: {}]   ;;  %s2178_s4 = inlined_call_operand.vmem [shape: f32[1,32], index: 4, kind: input, shape index: {}]   ;;  %s2179_s5 = inlined_call_operand.vmem [shape: f32[32,64], index: 5, kind: input, shape index: {}]   ;;  %s2180_s6 = inlined_call_operand.vmem [shape: f32[1,64], index: 6, kind: input, shape index: {}]   ;;  %s2181_s7 = inlined_call_operand.vmem [shape: f32[32,32], index: 7, kind: input, shape index: {}]   ;;  %s2182_s8 = inlined_call_operand.vmem [shape: f32[1,32], index: 8, kind: input, shape index: {}]   ;;  %s2183_s9 = inlined_call_operand.vmem [shape: f32[1,32], index: 9, kind: input, shape index: {}]   ;;  %s2184_s10 = inlined_call_operand.vmem [shape: f32[1,32], index: 10, kind: input, shape index: {}]   ;;  %s2185_s11 = inlined_call_operand.vmem [shape: f32[2,8,32], index: 11, kind: output, shape index: {0}]   ;;  %s2186_s12 = inlined_call_operand.hbm [shape: f32[2,4,8,8], index: 12, kind: output, shape index: {1}]  }
   0x1   :  { %2189 = sst [smem:[#allocation8_spill]] %s2175_s1  ;;  %s18_s23 = sshll.u32 %s2174_s0, 4  ;;  %s19_s23 = int_to_ptr.vmem [resolvable:$true] %s18_s23 }
   0x2   :  { %s1751_s24 = scalar_lea.vmem %s19_s23, 16  ;;  %p1756_p1 = scmp.lt.s32.totalorder %s19_s23, %s19_s23 }
   0x3   :  { %p1752_p0 = scmp.ne.s32.totalorder %s19_s23, %s1751_s24  ;;  %p1757_p2 = scmp.lt.s32.totalorder %s1751_s24, %s1751_s24 }
   0x5   :  { %p1758_p3 = por %p1757_p2, %p1756_p1 }
   0x7   :  { %p1759_p4 = pnand %p1758_p3, %p1752_p0 }
   0x9   :  { %1762 = shalt.err (!%p1759_p4)  }
   0xa   :  { %s1829_s25 = smov [#allocation3]  }
   0xb   :  { %21 = dma.vmem_to_smem %s19_s23, 16, %s1829_s25, [#allocation2] }
   0xc   :  { %1807 = dma.done.wait [#allocation2], 16 }
   0xd   :  { %1808 = vsyncadd [#allocation2], 4294967280 }
   0xe   :  { %23 = sfence }
   0xf   :  { %24 = vsyncpa [#allocation5], 0 }
  0x10   :  { %26 = vsyncpa [#allocation5 + $0x1], 0  ;;  %s1913_s26 = smov 0   ;;  %s1915_s27 = smov 0  }
  0x11   :  { %s1917_s0 = smov 0   ;;  %s1919_s28 = smov 0  }
  0x12 LB: > { %s1934_s29 = sadd.s32 4294967295, %s1827_s28   ;;  %s1520_s30 = sadd.s32 4294967294, %s1827_s28   ;;  %s1827_s28 = sphi %s1919_s28, %s2198_s28   ;;  %s1823_s0 = sphi %s1917_s0, %s2197_s0   ;;  %s1819_s27 = sphi %s1915_s27, %s2196_s27   ;;  %s1815_s26 = sphi %s1913_s26, %s2195_s26  }
  0x13   : > { %s1938_s13 = sadd.s32 1, %s1827_s28   ;;  %s285_s14 = sadd.s32 1, %s1823_s0 }
  0x14   : > { %s282_s15 = ssub.s32 %s1827_s28, %s1938_s13  ;;  %p295_p5 = scmp.ne.s32.totalorder %s1823_s0, %s1819_s27 }
  0x15   : > { %p283_p6 = scmp.eq.s32.totalorder %s282_s15, 0  ;;  %p296_p7 = scmp.eq.s32.totalorder %s1934_s29, 1 }
  0x16   : > { %p301_p8 = scmp.ne.s32.totalorder %s1819_s27, %s1815_s26  ;;  %p302_p9 = scmp.eq.s32.totalorder %s1520_s30, 1 }
  0x17   : > { %s1949_s16 = scalar_select %p283_p6, %s1823_s0, %s285_s14  }
  0x18   : > { %p1951_p10 = por %p296_p7, %p295_p5  ;;  %p1955_p11 = por %p302_p9, %p301_p8 }
  0x19   : > { %p1523_p12 = scmp.ge.s32.totalorder %s1827_s28, 1  ;;  %p358_p13 = scmp.lt.s32.totalorder %s1827_s28, 3 }
  0x1b   : > { %p359_p0 = pnand %p1523_p12, %p358_p13 }
  0x1c   : > { %v504_v0 = vld [vmem:[%s2179_s5] sm:$0xff] (!%p359_p0)  ;;  %v505_v1 = vld [vmem:[%s2179_s5 + $0x8] sm:$0xff] (!%p359_p0)  ;;  %v1830_v3 = vmov (!%p359_p0), 0.0|0.0   ;;  %v506_v6 = vld [vmem:[%s2179_s5 + $0x10] sm:$0xff] (!%p359_p0)  ;;  %p405_p1 = scmp.lt.s32.totalorder (!%p359_p0), %s1934_s29, 1  ;;  %vm1831_vm0 = vmmov (!%p359_p0), 0   ;;  %v588_v30 = vlaneseq (!%p359_p0) }
  0x1d   : > { %362 = sbr.rel (%p359_p0) target bundleno = 1771 (0x6eb), region = 60  ;;  %v419_v2 = vld [vmem:[%s2177_s3] sm:$0xff] (!%p359_p0)  ;;  %1667 = vmatprep.subr.bf16.mxu1 (!%p359_p0), %v1830_v3  ;;  %v1668_v4 = vpack.c.bf16 (!%p359_p0), %v505_v1, %v504_v0  ;;  %1661 = vmatprep.subr.bf16.mxu0 (!%p359_p0), %v1830_v3  ;;  %v420_v5 = vld [vmem:[%s2177_s3 + $0x8] sm:$0xff] (!%p359_p0)  ;;  %v507_v7 = vld [vmem:[%s2179_s5 + $0x18] sm:$0xff] (!%p359_p0)  ;;  %v1832_v9 = vmov (!%p359_p0), 0.0   ;;  %vm430_vm1 = vcmask (!%p359_p0), 261120  }
  0x1e   : > { %v1662_v8 = vpack.c.bf16 (!%p359_p0), %v420_v5, %v419_v2  ;;  %1607 = vmatprep.mubr.msk.f32.mxu1 (!%p359_p0), %vm1831_vm0, %v1832_v9  ;;  %v421_v10 = vld [vmem:[%s2177_s3 + $0x10] sm:$0xff] (!%p359_p0)  ;;  %v422_v11 = vld [vmem:[%s2177_s3 + $0x18] sm:$0xff] (!%p359_p0)  ;;  %1596 = vmatprep.mubr.msk.f32.mxu0 (!%p359_p0), %vm1831_vm0, %v1832_v9  ;;  %v1671_v12 = vpack.c.bf16 (!%p359_p0), %v507_v7, %v506_v6  ;;  %s2192_s1 = sld [smem:[#allocation8_spill]] (!%p359_p0)  ;;  %v1530_v16 = vld [vmem:[%s2180_s6] ss:$0 sm:$0xff] (!%p359_p0)  ;;  %vm594_vm2 = vcmask (!%p359_p0), 64512  }
  0x1f   : > { %1669 = vmatpush3.bf16.msra.mxu1 (!%p359_p0), %v1668_v4  ;;  %v1665_v13 = vpack.c.bf16 (!%p359_p0), %v422_v11, %v421_v10  ;;  %v1528_v18 = vld [vmem:[%s2178_s4] ss:$0 sm:$0xff] (!%p359_p0)  ;;  %s1833_s15 = smov (!%p359_p0), 112   ;;  %s1835_s20 = smov (!%p359_p0), 104   ;;  %v589_v31 = vand.u32 (!%p359_p0), 127, %v588_v30  ;;  %vm1281_vm4 = vcmask (!%p359_p0), 130048  }
  0x20   : > { %1663 = vmatpush3.bf16.msra.mxu0 (!%p359_p0), %v1662_v8  ;;  %1670 = vmatprep.subr.bf16.mxu1 (!%p359_p0), %v1830_v3  ;;  %s590_s21 = sld [smem:[#allocation3 + %s1934_s29]] (!%p359_p0)  ;;  %s1837_s23 = smov (!%p359_p0), 80   ;;  %vm1283_vm5 = vcmask (!%p359_p0), 195584  }
  0x21   : > { %1664 = vmatprep.subr.bf16.mxu0 (!%p359_p0), %v1830_v3  ;;  %s1838_s24 = smov (!%p359_p0), 72   ;;  %s2187_s14 = sand.u32 (!%p359_p0), 1, %s1819_s27  }
  0x23   : > { %1672 = vmatpush3.bf16.msra.mxu1 (!%p359_p0), %v1671_v12 }
  0x24   : > { %s406_s25 = scalar_select %p405_p1, %s1934_s29, 1  ;;  %1666 = vmatpush3.bf16.msra.mxu0 %v1665_v13  ;;  %1610 = vmatprep.subr.mxu1 %v1832_v9 }
  0x25   : > { %1620 = vmatprep.subr.mxu0 %v1832_v9 }
  0x26   : > { %s1995_s30 = sshll.u32 %s406_s25, 3  ;;  %v591_v32 = vstv %s590_s21  ;;  %s1839_s25 = smov 88  }
  0x27   : > { %s412_s19 = scalar_lea.vmem %s2176_s2, %s1995_s30  ;;  %s408_s22 = scalar_lea.vmem %s2192_s1, %s1995_s30  ;;  %vm592_vm3 = vcmp.ge.s32.totalorder %v589_v31, %v591_v32  ;;  %v1285_v31 = vld [vmem:[%s2181_s7] sm:$0xff]  ;;  %v1286_v32 = vld [vmem:[%s2181_s7 + $0x8] sm:$0xff] }
  0x28   : > { %v418_v14 = vld [vmem:[%s412_s19] sm:$0xff]  ;;  %s1834_s19 = smov 120   ;;  %v593_v34 = vsel %vm592_vm3, -1e+09, %v1832_v9  ;;  %s1841_s21 = smov 16  }
  0x29   : > { %v2005_v15 = vld [vmem:[%s408_s22] sm:$0xff]  ;;  %1608 = vmatmul.mubr.msk.f32.vlgmr.msra.gmra.mrb[0].mxu1 %vm430_vm1, %v418_v14  ;;  %s1836_s22 = smov 96  }
  0x2a   : > { %1597 = vmatmul.mubr.msk.f32.vlgmr.msra.gmra.mrb[0].mxu0 %vm430_vm1, %v2005_v15  ;;  %1612 = vmatprep.mubr.msk.f32.mxu1 %vm1831_vm0, %v1832_v9 }
  0x2b   : > { %1622 = vmatprep.mubr.msk.f32.mxu0 %vm1831_vm0, %v1832_v9 }
  0xfc   : > { %v584_v17 = vpop.f32.mrb[0].mxu1 }
  0xfd   : > { %v2022_v19 = vadd.f32 %v1530_v16, %v584_v17  ;;  %v1609_v20 = vpop.f32.mrb[1].mxu1  ;;  %v500_v21 = vpop.f32.mrb[0].mxu0 }
  0xfe   : > { %v1598_v22 = vpop.f32.mrb[1].mxu0  ;;  %v501_v23 = vadd.f32 %v1528_v18, %v500_v21 }
  0xff   : > { %932 = vrot.lane.b32.xlu1 %v2022_v19, %s1833_s15  ;;  %763 = vrot.lane.b32.xlu0 %v2022_v19, %s1834_s19 }
 0x100   : > { %1611 = vmatpush3.xpose.msk.msra.mxu1 %vm594_vm2, %v2022_v19 }
 0x101   : > { %1615 = vmatprep.subr.mxu1 %v1832_v9 }
 0x103   : > { %1613 = vmatmul.mubr.msk.f32.vlgmr.msra.gmra.mrb[2].mxu1 %vm594_vm2, %v501_v23  ;;  %930 = vrot.lane.b32.xlu1 %v501_v23, %s1833_s15  ;;  %s1524_s15 = sshll.u32 %s2187_s14, 5  ;;  %s2193_s14 = sand.u32 1, %s1819_s27  }
 0x104   : > { %761 = vrot.lane.b32.xlu0 %v501_v23, %s1834_s19  ;;  %1617 = vmatprep.mubr.msk.f32.mxu1 %vm1831_vm0, %v1832_v9  ;;  %s2066_s19 = scalar_lea.vmem [#allocation4], %s1524_s15 }
 0x107   : > { %1099 = vrot.lane.b32.xlu1 %v501_v23, %s1835_s20 }
 0x108   : > { %1101 = vrot.lane.b32.xlu0 %v2022_v19, %s1835_s20  ;;  %s2188_s20 = smov 8  }
 0x171   : > { %v764_v24 = vpop.permute.xlu0 %763  ;;  %v933_v25 = vpop.permute.xlu1 %932 }
 0x172   : > { %1621 = vmatpush3.xpose.msk.msra.mxu0 %vm594_vm2, %v764_v24 }
 0x173   : > { %1630 = vmatprep.subr.mxu0 %v1832_v9 }
 0x175   : > { %v931_v27 = vpop.permute.xlu1 %930 }
 0x176   : > { %v762_v26 = vpop.permute.xlu0 %761 }
 0x177   : > { %1623 = vmatmul.mubr.msk.f32.vlgmr.msra.gmra.mrb[2].mxu0 %vm594_vm2, %v762_v26 }
 0x178   : > { %1631 = vmatpush3.xpose.msk.msra.mxu0 %vm594_vm2, %v933_v25  ;;  %1632 = vmatprep.mubr.msk.f32.mxu0 %vm1831_vm0, %v1832_v9 }
 0x179   : > { %1640 = vmatprep.subr.mxu0 %v1832_v9  ;;  %v1100_v29 = vpop.permute.xlu1 %1099 }
 0x17a   : > { %v1102_v28 = vpop.permute.xlu0 %1101 }
 0x17b   : > { %1633 = vmatmul.mubr.msk.f32.vlgmr.msra.gmra.mrb[4].mxu0 %vm594_vm2, %v931_v27 }
 0x17c   : > { %1641 = vmatpush3.xpose.msk.msra.mxu0 %vm594_vm2, %v1102_v28  ;;  %1642 = vmatprep.mubr.msk.f32.mxu0 %vm1831_vm0, %v1832_v9 }
 0x17d   : > { %1673 = vmatprep.subr.bf16.mxu0 %v1830_v3 }
 0x17f   : > { %1643 = vmatmul.mubr.msk.f32.vlgmr.msra.gmra.mrb[6].mxu0 %vm594_vm2, %v1100_v29 }
 0x180   : > { %1658 = vmatprep.mubr.msk.f32.mxu0 %vm1831_vm0, %v1832_v9 }
 0x1d6   : > { %v667_v33 = vpop.f32.mrb[2].mxu1 }
 0x1d7   : > { %v671_v35 = vmul.f32 0.35355338, %v667_v33  ;;  %v1614_v36 = vpop.f32.mrb[3].mxu1  ;;  %v1674_v33 = vpack.c.bf16 %v1286_v32, %v1285_v31 }
 0x1d9   : > { %v672_v37 = vadd.f32 %v671_v35, %v593_v34  ;;  %1675 = vmatpush3.bf16.msra.mxu0 %v1674_v33 }
 0x1da   : > { %1676 = vmatprep.subr.bf16.mxu0 %v1830_v3 }
 0x1db   : > { %v673_v38 = vsel %vm594_vm2, %v672_v37, -inf }
 0x1dc   : > { %674 = vmax.xlane.f32.xlu0 %v673_v38 }
 0x24a   : > { %v835_v39 = vpop.f32.mrb[2].mxu0 }
 0x24b   : > { %v839_v40 = vmul.f32 0.35355338, %v835_v39  ;;  %v1624_v41 = vpop.f32.mrb[3].mxu0 }
 0x24d   : > { %v840_v42 = vadd.f32 %v839_v40, %v593_v34 }
 0x24e   : > { %v1004_v43 = vpop.f32.mrb[4].mxu0 }
 0x24f   : > { %v1008_v44 = vmul.f32 0.35355338, %v1004_v43  ;;  %v1634_v45 = vpop.f32.mrb[5].mxu0  ;;  %v841_v46 = vsel %vm594_vm2, %v840_v42, -inf }
 0x250   : > { %842 = vmax.xlane.f32.xlu1 %v841_v46 }
 0x251   : > { %v1009_v47 = vadd.f32 %v1008_v44, %v593_v34 }
 0x252   : > { %v1173_v48 = vpop.f32.mrb[6].mxu0 }
 0x253   : > { %v1177_v49 = vmul.f32 0.35355338, %v1173_v48  ;;  %v1644_v50 = vpop.f32.mrb[7].mxu0  ;;  %v1010_v51 = vsel %vm594_vm2, %v1009_v47, -inf }
 0x254   : > { %1011 = vmax.xlane.f32.xlu0 %v1010_v51 }
 0x255   : > { %v1178_v52 = vadd.f32 %v1177_v49, %v593_v34  ;;  %v1288_v34 = vld [vmem:[%s2181_s7 + $0x18] sm:$0xff] }
 0x257   : > { %v1179_v53 = vsel %vm594_vm2, %v1178_v52, -inf }
 0x258   : > { %1180 = vmax.xlane.f32.xlu0 %v1179_v53 }
 0x261   : > { %685 = vrot.lane.b32.xlu1 %v2022_v19, %s1836_s22  ;;  %s1842_s22 = smov 24  }
 0x269   : > { %v675_v54 = vpop.xlane.xlu0 %674 }
 0x26a   : > { %v676_v55 = vsub.f32 %v672_v37, %v675_v54 }
 0x26c   : > { %v677_v56 = vmul.f32 1.442695, %v676_v55 }
 0x26e   : > { %1733 = vpow2.f32 %v677_v56 }
 0x278   : > { %v1734_v57 = vpop.eup %1733 }
 0x279   : > { %v679_v58 = vsel %vm594_vm2, %v1734_v57, 0.0 }
 0x285   : > { %680 = vadd.xlane.f32.xlu1 %v679_v58 }
 0x2dd   : > { %v843_v59 = vpop.xlane.xlu1 %842 }
 0x2de   : > { %v844_v60 = vsub.f32 %v840_v42, %v843_v59 }
 0x2e0   : > { %v845_v61 = vmul.f32 1.442695, %v844_v60 }
 0x2e1   : > { %v686_v62 = vpop.permute.xlu1 %685  ;;  %v1012_v63 = vpop.xlane.xlu0 %1011 }
 0x2e2   : > { %1735 = vpow2.f32 %v845_v61  ;;  %v1013_v0 = vsub.f32 %v1009_v47, %v1012_v63  ;;  %1616 = vmatpush3.msra.mxu1 %v686_v62  ;;  %v1547_v47 = vld [vmem:[%s2182_s8] ss:$0 sm:$0xff] }
 0x2e3   : > { %1625 = vmatprep.subr.mxu1 %v1832_v9 }
 0x2e4   : > { %v1014_v1 = vmul.f32 1.442695, %v1013_v0 }
 0x2e5   : > { %v1181_v2 = vpop.xlane.xlu0 %1180 }
 0x2e6   : > { %1737 = vpow2.f32 %v1014_v1  ;;  %v1182_v4 = vsub.f32 %v1178_v52, %v1181_v2 }
 0x2e8   : > { %v1183_v5 = vmul.f32 1.442695, %v1182_v4 }
 0x2ea   : > { %1739 = vpow2.f32 %v1183_v5 }
 0x2ec   : > { %v1736_v6 = vpop.eup %1735 }
 0x2ed   : > { %v847_v7 = vsel %vm594_vm2, %v1736_v6, 0.0 }
 0x2ee   : > { %848 = vadd.xlane.f32.xlu0 %v847_v7 }
 0x2f0   : > { %v1738_v8 = vpop.eup %1737 }
 0x2f1   : > { %v1016_v10 = vsel %vm594_vm2, %v1738_v8, 0.0 }
 0x2f2   : > { %1017 = vadd.xlane.f32.xlu1 %v1016_v10 }
 0x2f4   : > { %v1740_v11 = vpop.eup %1739 }
 0x2f5   : > { %v1185_v12 = vsel %vm594_vm2, %v1740_v11, 0.0 }
 0x2f6   : > { %1186 = vadd.xlane.f32.xlu0 %v1185_v12 }
 0x303   : > { %1023 = vrot.lane.b32.xlu1 %v2022_v19, %s1837_s23  ;;  %s2121_s23 = scalar_lea.sflag [#allocation5], %s2193_s14 }
 0x307   : > { %1192 = vrot.lane.b32.xlu1 %v2022_v19, %s1838_s24  ;;  %s1556_s24 = sshll.u32 %s1934_s29, 9  ;;  %s1843_s29 = smov [#allocation4]  }
 0x30c   : > { %854 = vrot.lane.b32.xlu0 %v2022_v19, %s1839_s25  ;;  %s1422_s25 = sshll.u32 %s2066_s19, 4  ;;  %s2117_s25 = int_to_ptr.vmem [resolvable:$true] %s1422_s25 }
 0x312   : > { %v681_v13 = vpop.xlane.xlu1 %680 }
 0x313   : > { %1741 = vrcp.f32 %v681_v13 }
 0x31d   : > { %v1742_v14 = vpop.eup %1741 }
 0x31e   : > { %v683_v16 = vmul.f32 %v1742_v14, %v1734_v57 }
 0x320   : > { %684 = vst.msk [vmem:[%s2066_s19] sm:$0xff] %vm594_vm2, %v683_v16  ;;  %1618 = vmatmul.mubr.msk.f32.vlgmr.msra.gmra.mrb[4].mxu1 %vm594_vm2, %v683_v16 }
 0x321   : > { %1627 = vmatprep.mubr.msk.f32.mxu1 %vm1831_vm0, %v1832_v9 }
 0x37b   : > { %v849_v17 = vpop.xlane.xlu0 %848 }
 0x37c   : > { %1743 = vrcp.f32 %v849_v17 }
 0x37f   : > { %v1018_v18 = vpop.xlane.xlu1 %1017 }
 0x380   : > { %1745 = vrcp.f32 %v1018_v18 }
 0x383   : > { %v1187_v19 = vpop.xlane.xlu0 %1186  ;;  %v1024_v22 = vpop.permute.xlu1 %1023 }
 0x384   : > { %1747 = vrcp.f32 %v1187_v19 }
 0x386   : > { %v1744_v20 = vpop.eup %1743 }
 0x387   : > { %v851_v21 = vmul.f32 %v1744_v20, %v1736_v6  ;;  %v855_v23 = vpop.permute.xlu0 %854  ;;  %v1193_v26 = vpop.permute.xlu1 %1192 }
 0x388   : > { %1626 = vmatpush3.msra.mxu1 %v855_v23 }
 0x389   : > { %1537 = vst.msk [vmem:[%s2066_s19 + $0x8] sm:$0xff] %vm594_vm2, %v851_v21  ;;  %1628 = vmatmul.mubr.msk.f32.vlgmr.msra.gmra.mrb[6].mxu1 %vm594_vm2, %v851_v21  ;;  %1635 = vmatprep.subr.mxu1 %v1832_v9 }
 0x38a   : > { %v1746_v24 = vpop.eup %1745  ;;  %1636 = vmatpush3.msra.mxu1 %v1024_v22  ;;  %1637 = vmatprep.mubr.msk.f32.mxu1 %vm1831_vm0, %v1832_v9 }
 0x38b   : > { %v1020_v25 = vmul.f32 %v1746_v24, %v1738_v8  ;;  %1645 = vmatprep.subr.mxu1 %v1832_v9 }
 0x38d   : > { %1541 = vst.msk [vmem:[%s2066_s19 + $0x10] sm:$0xff] %vm594_vm2, %v1020_v25  ;;  %1638 = vmatmul.mubr.msk.f32.vlgmr.msra.gmra.mrb[8].mxu1 %vm594_vm2, %v1020_v25 }
 0x38e   : > { %v1748_v27 = vpop.eup %1747  ;;  %1646 = vmatpush3.msra.mxu1 %v1193_v26  ;;  %1647 = vmatprep.mubr.msk.f32.mxu1 %vm1831_vm0, %v1832_v9  ;;  %v1287_v9 = vld [vmem:[%s2181_s7 + $0x10] sm:$0xff] }
 0x38f   : > { %v1189_v28 = vmul.f32 %v1748_v27, %v1740_v11  ;;  %v1677_v35 = vpack.c.bf16 %v1288_v34, %v1287_v9 }
 0x391   : > { %1545 = vst.msk [vmem:[%s2066_s19 + $0x18] sm:$0xff] %vm594_vm2, %v1189_v28  ;;  %1648 = vmatmul.mubr.msk.f32.vlgmr.msra.gmra.mrb[10].mxu1 %vm594_vm2, %v1189_v28  ;;  %1678 = vmatpush3.bf16.msra.mxu0 %v1677_v35  ;;  %s1767_s19 = sshll.u32 %s1843_s29, 4  ;;  %s1768_s19 = int_to_ptr.vmem [resolvable:$false] %s1767_s19 }
 0x392   : > { %s1769_s1 = scalar_lea.vmem %s1768_s19, 1024  ;;  %p1770_p5 = scmp.lt.s32.totalorder %s2117_s25, %s1768_s19 }
 0x3f3   : > { %v757_v29 = vpop.f32.mrb[4].mxu1 }
 0x3f4   : > { %v1619_v30 = vpop.f32.mrb[5].mxu1 }
 0x45c   : > { %v926_v36 = vpop.f32.mrb[6].mxu1 }
 0x45d   : > { %1269 = vrot.lane.b32.xlu0 %v926_v36, %s2188_s20  ;;  %v1629_v37 = vpop.f32.mrb[7].mxu1  ;;  %s1763_s20 = scalar_lea.vmem %s2117_s25, 512 }
 0x45e   : > { %p1764_p2 = scmp.ne.s32.totalorder %s2117_s25, %s1763_s20  ;;  %p1771_p6 = scmp.lt.s32.totalorder %s1769_s1, %s1763_s20 }
 0x460   : > { %v1095_v38 = vpop.f32.mrb[8].mxu1  ;;  %p1765_p3 = pnand %p1764_p2, %p1951_p10  ;;  %p1772_p7 = por %p1771_p6, %p1770_p5 }
 0x461   : > { %1273 = vrot.lane.b32.xlu1 %v1095_v38, %s1841_s21  ;;  %v1639_v39 = vpop.f32.mrb[9].mxu1 }
 0x462   : > { %p1766_p4 = pneg %p1765_p3 }
 0x464   : > { %v1264_v3 = vpop.f32.mrb[10].mxu1  ;;  %p1773_p8 = pnand %p1772_p7, %p1766_p4 }
 0x465   : > { %1277 = vrot.lane.b32.xlu0 %v1264_v3, %s1842_s22  ;;  %v1649_v40 = vpop.f32.mrb[11].mxu1  ;;  %s2115_s22 = scalar_lea.hbm %s2186_s12, %s1556_s24 }
 0x4cf   : > { %v1270_v41 = vpop.permute.xlu0 %1269 }
 0x4d0   : > { %v1280_v43 = vsel %vm594_vm2, %v757_v29, %v1270_v41 }
 0x4d3   : > { %v1274_v42 = vpop.permute.xlu1 %1273 }
 0x4d4   : > { %v1282_v44 = vsel %vm1281_vm4, %v1280_v43, %v1274_v42 }
 0x4d7   : > { %v1278_v45 = vpop.permute.xlu0 %1277 }
 0x4d8   : > { %v1284_v46 = vsel %vm1283_vm5, %v1282_v44, %v1278_v45 }
 0x4d9   : > { %1659 = vmatmul.mubr.msk.f32.vlgmr.msra.gmra.mrb[8].mxu0 %vm430_vm1, %v1284_v46 }
 0x5ac   : > { %v1365_v48 = vpop.f32.mrb[8].mxu0 }
 0x5ad   : > { %v1366_v49 = vadd.f32 %v1547_v47, %v1365_v48  ;;  %v1660_v50 = vpop.f32.mrb[9].mxu0 }
 0x5af   : > { %v1369_v51 = vadd.f32 %v1366_v49, %v2005_v15 }
 0x5b1   : > { %v1372_v52 = vsel %vm430_vm1, %v1369_v51, 0.0 }
 0x5b2   : > { %1373 = vadd.xlane.f32.xlu1 %v1372_v52 }
 0x63f   : > { %v1374_v53 = vpop.xlane.xlu1 %1373 }
 0x640   : > { %v1376_v54 = vmul.f32 0.03125, %v1374_v53 }
 0x642   : > { %v1377_v55 = vsub.f32 %v1369_v51, %v1376_v54 }
 0x644   : > { %v1378_v56 = vmul.f32 %v1377_v55, %v1377_v55 }
 0x646   : > { %v1379_v57 = vsel %vm430_vm1, %v1378_v56, 0.0 }
 0x647   : > { %1380 = vadd.xlane.f32.xlu0 %v1379_v57 }
 0x648   : > { %1776 = shalt.err (!%p1773_p8)
}
 0x649   : > { %s1777_s24 = scalar_lea.hbm %s2115_s22, 512  ;;  %s1781_s14 = scalar_lea.hbm %s2186_s12, 1024 }
 0x64a   : > { %p1778_p9 = scmp.ne.s32.totalorder %s2115_s22, %s1777_s24  ;;  %p1782_p0 = scmp.lt.u32.totalorder %s2115_s22, %s2186_s12 }
 0x64b   : > { %p1783_p1 = scmp.lt.u32.totalorder %s1781_s14, %s1777_s24  ;;  %p1785_p3 = scmp.lt.u32.totalorder %s1777_s24, %s2115_s22 }
 0x64c   : > { %p1779_p12 = pnand %p1778_p9, %p1951_p10 }
 0x64d   : > { %p1784_p2 = por %p1783_p1, %p1782_p0 }
 0x64e   : > { %p1780_p13 = pneg %p1779_p12 }
 0x64f   : > { %p1786_p4 = por %p1785_p3, %p1784_p2 }
 0x651   : > { %p1787_p5 = pnand %p1786_p4, %p1780_p13 }
 0x653   : > { %1790 = shalt.err (!%p1787_p5)
}
 0x654   : > { %s1844_s1 = smov 128   ;;  %s2194_s20 = smov 8   ;;  %v1549_v61 = vld [vmem:[%s2183_s9] ss:$0 sm:$0xff] }
 0x655   : > { %1679 = dma.vmem_to_hbm [thread:$0]  (%p1951_p10), %s2117_s25, 512, %s2115_s22, %s2121_s23, %s1844_s1, %s1844_s1, %s2194_s20  }
 0x656   : > { %v1550_v63 = vld [vmem:[%s2184_s10] ss:$0 sm:$0xff]  ;;  %s416_s19 = scalar_lea.vmem %s2185_s11, %s1995_s30 }
 0x6d4   : > { %v1381_v15 = vpop.xlane.xlu0 %1380 }
 0x6d5   : > { %v1382_v58 = vmul.f32 0.03125, %v1381_v15 }
 0x6d7   : > { %v1383_v59 = vadd.f32 1e-05, %v1382_v58 }
 0x6d9   : > { %1749 = vrsqrt.f32 %v1383_v59 }
 0x6e3   : > { %v1750_v60 = vpop.eup %1749 }
 0x6e4   : > { %v1385_v62 = vmul.f32 %v1750_v60, %v1377_v55 }
 0x6e6   : > { %v1392_v0 = vmul.f32 %v1549_v61, %v1385_v62 }
 0x6e8   : > { %v1399_v1 = vadd.f32 %v1550_v63, %v1392_v0 }
 0x6ea   : > { %1400 = vst.msk [vmem:[%s416_s19] sm:$0xff] %vm430_vm1, %v1399_v1 }
 0x6eb PF: > { %p1685_p10 = scmp.ge.s32.totalorder %s1827_s28, 2  ;;  %s1444_s25 = sand.u32 1, %s1815_s26  }
 0x6ec   : > { %s1445_s22 = scalar_lea.sflag [#allocation5], %s1444_s25 }
 0x6ed   : > { %p1682_p6 = pnand %p1685_p10, %p1955_p11 }
 0x6ef   : > { %1810 = dma.done.wait (!%p1682_p6), %s1445_s22, 512  }
 0x6f0   : > { %1812 = vsyncadd (!%p1682_p6), %s1445_s22, 4294966784  ;;  %p29_p7 = scmp.ge.s32.totalorder %s1938_s13, 4   ;;  %s2195_s26 = smov %s1819_s27 }
 0x6f1   : > { %s2196_s27 = smov %s1823_s0  ;;  %s2197_s0 = smov %s1949_s16 }
 0x6f2   : > { %s2198_s28 = smov %s1938_s13  ;;  %31 = sbr.rel (!%p29_p7) target bundleno = 18 (0x12), region = 113 }
 0x6f9   :  { %1450 = vsyncpa [#allocation5], 1 }
 0x6fa   :  { %1452 = vsyncpa [#allocation5 + $0x1], 1 }

// kernel: speech_transformer_forward.12
= control target key start
LH: loop header
LB: loop body
LE: loop exit
PB: predicated region body
PF: predicated region fallthrough
CT: control target
= control target key end

     0   :  { %s2173_s0 = inlined_call_operand.vmem [shape: s32[2], index: 0, kind: input, shape index: {}]   ;;  %s2174_s1 = inlined_call_operand.vmem [shape: f32[2,8,32], index: 1, kind: input, shape index: {}, may-alias: {1,2}]   ;;  %s2175_s2 = inlined_call_operand.vmem [shape: f32[2,8,32], index: 2, kind: input, shape index: {}, may-alias: {1,2}]   ;;  %s2176_s3 = inlined_call_operand.vmem [shape: f32[32,32], index: 3, kind: input, shape index: {}]   ;;  %s2177_s4 = inlined_call_operand.vmem [shape: f32[1,32], index: 4, kind: input, shape index: {}]   ;;  %s2178_s5 = inlined_call_operand.vmem [shape: f32[32,64], index: 5, kind: input, shape index: {}]   ;;  %s2179_s6 = inlined_call_operand.vmem [shape: f32[1,64], index: 6, kind: input, shape index: {}]   ;;  %s2180_s7 = inlined_call_operand.vmem [shape: f32[32,32], index: 7, kind: input, shape index: {}]   ;;  %s2181_s8 = inlined_call_operand.vmem [shape: f32[1,32], index: 8, kind: input, shape index: {}]   ;;  %s2182_s9 = inlined_call_operand.vmem [shape: f32[1,32], index: 9, kind: input, shape index: {}]   ;;  %s2183_s10 = inlined_call_operand.vmem [shape: f32[1,32], index: 10, kind: input, shape index: {}]   ;;  %s2184_s11 = inlined_call_operand.vmem [shape: f32[2,8,32], index: 11, kind: output, shape index: {0}]   ;;  %s2185_s12 = inlined_call_operand.hbm [shape: f32[2,4,8,8], index: 12, kind: output, shape index: {1}]  }
   0x1   :  { %2188 = sst [smem:[#allocation8_spill]] %s2174_s1  ;;  %s18_s23 = sshll.u32 %s2173_s0, 4  ;;  %s19_s23 = int_to_ptr.vmem [resolvable:$true] %s18_s23 }
   0x2   :  { %s1751_s24 = scalar_lea.vmem %s19_s23, 16  ;;  %p1756_p1 = scmp.lt.s32.totalorder %s19_s23, %s19_s23 }
   0x3   :  { %p1752_p0 = scmp.ne.s32.totalorder %s19_s23, %s1751_s24  ;;  %p1757_p2 = scmp.lt.s32.totalorder %s1751_s24, %s1751_s24 }
   0x5   :  { %p1758_p3 = por %p1757_p2, %p1756_p1 }
   0x7   :  { %p1759_p4 = pnand %p1758_p3, %p1752_p0 }
   0x9   :  { %1762 = shalt.err (!%p1759_p4)  }
   0xa   :  { %s1829_s25 = smov [#allocation3]  }
   0xb   :  { %21 = dma.vmem_to_smem %s19_s23, 16, %s1829_s25, [#allocation2] }
   0xc   :  { %1807 = dma.done.wait [#allocation2], 16 }
   0xd   :  { %1808 = vsyncadd [#allocation2], 4294967280 }
   0xe   :  { %23 = sfence }
   0xf   :  { %24 = vsyncpa [#allocation5], 0 }
  0x10   :  { %26 = vsyncpa [#allocation5 + $0x1], 0  ;;  %s1913_s26 = smov 0   ;;  %s1915_s27 = smov 0  }
  0x11   :  { %s1917_s0 = smov 0   ;;  %s1919_s28 = smov 0  }
  0x12 LB: > { %s1934_s29 = sadd.s32 4294967295, %s1827_s28   ;;  %s1520_s30 = sadd.s32 4294967294, %s1827_s28   ;;  %s1827_s28 = sphi %s1919_s28, %s2197_s28   ;;  %s1823_s0 = sphi %s1917_s0, %s2196_s0   ;;  %s1819_s27 = sphi %s1915_s27, %s2195_s27   ;;  %s1815_s26 = sphi %s1913_s26, %s2194_s26  }
  0x13   : > { %s1938_s13 = sadd.s32 1, %s1827_s28   ;;  %s285_s14 = sadd.s32 1, %s1823_s0 }
  0x14   : > { %s282_s15 = ssub.s32 %s1827_s28, %s1938_s13  ;;  %p295_p5 = scmp.ne.s32.totalorder %s1823_s0, %s1819_s27 }
  0x15   : > { %p283_p6 = scmp.eq.s32.totalorder %s282_s15, 0  ;;  %p296_p7 = scmp.eq.s32.totalorder %s1934_s29, 1 }
  0x16   : > { %p301_p8 = scmp.ne.s32.totalorder %s1819_s27, %s1815_s26  ;;  %p302_p9 = scmp.eq.s32.totalorder %s1520_s30, 1 }
  0x17   : > { %s1949_s16 = scalar_select %p283_p6, %s1823_s0, %s285_s14  }
  0x18   : > { %p1951_p10 = por %p296_p7, %p295_p5  ;;  %p1955_p11 = por %p302_p9, %p301_p8 }
  0x19   : > { %p1523_p12 = scmp.ge.s32.totalorder %s1827_s28, 1  ;;  %p358_p13 = scmp.lt.s32.totalorder %s1827_s28, 3 }
  0x1b   : > { %p359_p0 = pnand %p1523_p12, %p358_p13 }
  0x1c   : > { %v504_v0 = vld [vmem:[%s2178_s5] sm:$0xff] (!%p359_p0)  ;;  %v505_v1 = vld [vmem:[%s2178_s5 + $0x8] sm:$0xff] (!%p359_p0)  ;;  %v1830_v3 = vmov (!%p359_p0), 0.0|0.0   ;;  %v506_v6 = vld [vmem:[%s2178_s5 + $0x10] sm:$0xff] (!%p359_p0)  ;;  %p405_p1 = scmp.lt.s32.totalorder (!%p359_p0), %s1934_s29, 1  ;;  %vm1831_vm0 = vmmov (!%p359_p0), 0   ;;  %v588_v30 = vlaneseq (!%p359_p0) }
  0x1d   : > { %362 = sbr.rel (%p359_p0) target bundleno = 1771 (0x6eb), region = 60  ;;  %v419_v2 = vld [vmem:[%s2176_s3] sm:$0xff] (!%p359_p0)  ;;  %1667 = vmatprep.subr.bf16.mxu1 (!%p359_p0), %v1830_v3  ;;  %v1668_v4 = vpack.c.bf16 (!%p359_p0), %v505_v1, %v504_v0  ;;  %1661 = vmatprep.subr.bf16.mxu0 (!%p359_p0), %v1830_v3  ;;  %v420_v5 = vld [vmem:[%s2176_s3 + $0x8] sm:$0xff] (!%p359_p0)  ;;  %v507_v7 = vld [vmem:[%s2178_s5 + $0x18] sm:$0xff] (!%p359_p0)  ;;  %v1832_v9 = vmov (!%p359_p0), 0.0   ;;  %vm430_vm1 = vcmask (!%p359_p0), 261120  }
  0x1e   : > { %v1662_v8 = vpack.c.bf16 (!%p359_p0), %v420_v5, %v419_v2  ;;  %1607 = vmatprep.mubr.msk.f32.mxu1 (!%p359_p0), %vm1831_vm0, %v1832_v9  ;;  %v421_v10 = vld [vmem:[%s2176_s3 + $0x10] sm:$0xff] (!%p359_p0)  ;;  %v422_v11 = vld [vmem:[%s2176_s3 + $0x18] sm:$0xff] (!%p359_p0)  ;;  %1596 = vmatprep.mubr.msk.f32.mxu0 (!%p359_p0), %vm1831_vm0, %v1832_v9  ;;  %v1671_v12 = vpack.c.bf16 (!%p359_p0), %v507_v7, %v506_v6  ;;  %s2191_s1 = sld [smem:[#allocation8_spill]] (!%p359_p0)  ;;  %v1530_v16 = vld [vmem:[%s2179_s6] ss:$0 sm:$0xff] (!%p359_p0)  ;;  %vm594_vm2 = vcmask (!%p359_p0), 64512  }
  0x1f   : > { %1669 = vmatpush3.bf16.msra.mxu1 (!%p359_p0), %v1668_v4  ;;  %v1665_v13 = vpack.c.bf16 (!%p359_p0), %v422_v11, %v421_v10  ;;  %v1528_v18 = vld [vmem:[%s2177_s4] ss:$0 sm:$0xff] (!%p359_p0)  ;;  %s1833_s15 = smov (!%p359_p0), 112   ;;  %s1835_s20 = smov (!%p359_p0), 104   ;;  %v589_v31 = vand.u32 (!%p359_p0), 127, %v588_v30  ;;  %v591_v32 = vshrl.u32 (!%p359_p0), %v588_v30, 7 }
  0x20   : > { %1663 = vmatpush3.bf16.msra.mxu0 (!%p359_p0), %v1662_v8  ;;  %1670 = vmatprep.subr.bf16.mxu1 (!%p359_p0), %v1830_v3  ;;  %s1836_s21 = smov (!%p359_p0), 96   ;;  %s1838_s23 = smov (!%p359_p0), 72   ;;  %vm1281_vm4 = vcmask (!%p359_p0), 130048   ;;  %vm1283_vm5 = vcmask (!%p359_p0), 195584  }
  0x21   : > { %1664 = vmatprep.subr.bf16.mxu0 (!%p359_p0), %v1830_v3  ;;  %vm592_vm3 = vcmp.gt.s32.totalorder (!%p359_p0), %v589_v31, %v591_v32  ;;  %s1839_s24 = smov (!%p359_p0), 88   ;;  %v1285_v31 = vld [vmem:[%s2180_s7] sm:$0xff] (!%p359_p0)  ;;  %v1286_v32 = vld [vmem:[%s2180_s7 + $0x8] sm:$0xff] (!%p359_p0) }
  0x22   : > { %v593_v34 = vsel (!%p359_p0), %vm592_vm3, -1e+09, %v1832_v9 }
  0x23   : > { %1672 = vmatpush3.bf16.msra.mxu1 (!%p359_p0), %v1671_v12 }
  0x24   : > { %s406_s25 = scalar_select %p405_p1, %s1934_s29, 1  ;;  %1666 = vmatpush3.bf16.msra.mxu0 %v1665_v13  ;;  %1610 = vmatprep.subr.mxu1 %v1832_v9 }
  0x25   : > { %1620 = vmatprep.subr.mxu0 %v1832_v9 }
  0x26   : > { %s1995_s30 = sshll.u32 %s406_s25, 3  ;;  %s2186_s25 = sand.u32 1, %s1819_s27  }
  0x27   : > { %s412_s19 = scalar_lea.vmem %s2175_s2, %s1995_s30  ;;  %s408_s22 = scalar_lea.vmem %s2191_s1, %s1995_s30 }
  0x28   : > { %v418_v14 = vld [vmem:[%s412_s19] sm:$0xff]  ;;  %s1834_s19 = smov 120   ;;  %s1524_s14 = sshll.u32 %s2186_s25, 5 }
  0x29   : > { %v2005_v15 = vld [vmem:[%s408_s22] sm:$0xff]  ;;  %1608 = vmatmul.mubr.msk.f32.vlgmr.msra.gmra.mrb[0].mxu1 %vm430_vm1, %v418_v14  ;;  %s1837_s22 = smov 80   ;;  %s2192_s25 = sand.u32 1, %s1819_s27  }
  0x2a   : > { %1597 = vmatmul.mubr.msk.f32.vlgmr.msra.gmra.mrb[0].mxu0 %vm430_vm1, %v2005_v15  ;;  %1612 = vmatprep.mubr.msk.f32.mxu1 %vm1831_vm0, %v1832_v9 }
  0x2b   : > { %1622 = vmatprep.mubr.msk.f32.mxu0 %vm1831_vm0, %v1832_v9 }
  0xfc   : > { %v584_v17 = vpop.f32.mrb[0].mxu1 }
  0xfd   : > { %v2022_v19 = vadd.f32 %v1530_v16, %v584_v17  ;;  %v1609_v20 = vpop.f32.mrb[1].mxu1  ;;  %v500_v21 = vpop.f32.mrb[0].mxu0 }
  0xfe   : > { %v1598_v22 = vpop.f32.mrb[1].mxu0  ;;  %v501_v23 = vadd.f32 %v1528_v18, %v500_v21 }
  0xff   : > { %932 = vrot.lane.b32.xlu1 %v2022_v19, %s1833_s15  ;;  %763 = vrot.lane.b32.xlu0 %v2022_v19, %s1834_s19 }
 0x100   : > { %1611 = vmatpush3.xpose.msk.msra.mxu1 %vm594_vm2, %v2022_v19 }
 0x101   : > { %1615 = vmatprep.subr.mxu1 %v1832_v9 }
 0x103   : > { %1613 = vmatmul.mubr.msk.f32.vlgmr.msra.gmra.mrb[2].mxu1 %vm594_vm2, %v501_v23  ;;  %930 = vrot.lane.b32.xlu1 %v501_v23, %s1833_s15  ;;  %s2065_s15 = scalar_lea.vmem [#allocation4], %s1524_s14 }
 0x104   : > { %761 = vrot.lane.b32.xlu0 %v501_v23, %s1834_s19  ;;  %1617 = vmatprep.mubr.msk.f32.mxu1 %vm1831_vm0, %v1832_v9  ;;  %s2187_s19 = smov 8  }
 0x107   : > { %1099 = vrot.lane.b32.xlu1 %v501_v23, %s1835_s20 }
 0x108   : > { %1101 = vrot.lane.b32.xlu0 %v2022_v19, %s1835_s20  ;;  %s1841_s20 = smov 16  }
 0x171   : > { %v764_v24 = vpop.permute.xlu0 %763  ;;  %v933_v25 = vpop.permute.xlu1 %932 }
 0x172   : > { %1621 = vmatpush3.xpose.msk.msra.mxu0 %vm594_vm2, %v764_v24 }
 0x173   : > { %1630 = vmatprep.subr.mxu0 %v1832_v9 }
 0x175   : > { %v931_v27 = vpop.permute.xlu1 %930 }
 0x176   : > { %v762_v26 = vpop.permute.xlu0 %761 }
 0x177   : > { %1623 = vmatmul.mubr.msk.f32.vlgmr.msra.gmra.mrb[2].mxu0 %vm594_vm2, %v762_v26 }
 0x178   : > { %1631 = vmatpush3.xpose.msk.msra.mxu0 %vm594_vm2, %v933_v25  ;;  %1632 = vmatprep.mubr.msk.f32.mxu0 %vm1831_vm0, %v1832_v9 }
 0x179   : > { %1640 = vmatprep.subr.mxu0 %v1832_v9  ;;  %v1100_v29 = vpop.permute.xlu1 %1099 }
 0x17a   : > { %v1102_v28 = vpop.permute.xlu0 %1101 }
 0x17b   : > { %1633 = vmatmul.mubr.msk.f32.vlgmr.msra.gmra.mrb[4].mxu0 %vm594_vm2, %v931_v27 }
 0x17c   : > { %1641 = vmatpush3.xpose.msk.msra.mxu0 %vm594_vm2, %v1102_v28  ;;  %1642 = vmatprep.mubr.msk.f32.mxu0 %vm1831_vm0, %v1832_v9 }
 0x17d   : > { %1673 = vmatprep.subr.bf16.mxu0 %v1830_v3 }
 0x17f   : > { %1643 = vmatmul.mubr.msk.f32.vlgmr.msra.gmra.mrb[6].mxu0 %vm594_vm2, %v1100_v29 }
 0x180   : > { %1658 = vmatprep.mubr.msk.f32.mxu0 %vm1831_vm0, %v1832_v9 }
 0x1d6   : > { %v667_v33 = vpop.f32.mrb[2].mxu1 }
 0x1d7   : > { %v671_v35 = vmul.f32 0.35355338, %v667_v33  ;;  %v1614_v36 = vpop.f32.mrb[3].mxu1  ;;  %v1674_v33 = vpack.c.bf16 %v1286_v32, %v1285_v31 }
 0x1d9   : > { %v672_v37 = vadd.f32 %v671_v35, %v593_v34  ;;  %1675 = vmatpush3.bf16.msra.mxu0 %v1674_v33 }
 0x1da   : > { %1676 = vmatprep.subr.bf16.mxu0 %v1830_v3 }
 0x1db   : > { %v673_v38 = vsel %vm594_vm2, %v672_v37, -inf }
 0x1dc   : > { %674 = vmax.xlane.f32.xlu0 %v673_v38 }
 0x24a   : > { %v835_v39 = vpop.f32.mrb[2].mxu0 }
 0x24b   : > { %v839_v40 = vmul.f32 0.35355338, %v835_v39  ;;  %v1624_v41 = vpop.f32.mrb[3].mxu0 }
 0x24d   : > { %v840_v42 = vadd.f32 %v839_v40, %v593_v34 }
 0x24e   : > { %v1004_v43 = vpop.f32.mrb[4].mxu0 }
 0x24f   : > { %v1008_v44 = vmul.f32 0.35355338, %v1004_v43  ;;  %v1634_v45 = vpop.f32.mrb[5].mxu0  ;;  %v841_v46 = vsel %vm594_vm2, %v840_v42, -inf }
 0x250   : > { %842 = vmax.xlane.f32.xlu1 %v841_v46 }
 0x251   : > { %v1009_v47 = vadd.f32 %v1008_v44, %v593_v34 }
 0x252   : > { %v1173_v48 = vpop.f32.mrb[6].mxu0 }
 0x253   : > { %v1177_v49 = vmul.f32 0.35355338, %v1173_v48  ;;  %v1644_v50 = vpop.f32.mrb[7].mxu0  ;;  %v1010_v51 = vsel %vm594_vm2, %v1009_v47, -inf }
 0x254   : > { %1011 = vmax.xlane.f32.xlu0 %v1010_v51 }
 0x255   : > { %v1178_v52 = vadd.f32 %v1177_v49, %v593_v34  ;;  %v1288_v34 = vld [vmem:[%s2180_s7 + $0x18] sm:$0xff] }
 0x257   : > { %v1179_v53 = vsel %vm594_vm2, %v1178_v52, -inf }
 0x258   : > { %1180 = vmax.xlane.f32.xlu0 %v1179_v53 }
 0x261   : > { %685 = vrot.lane.b32.xlu1 %v2022_v19, %s1836_s21  ;;  %s1842_s21 = smov 24  }
 0x269   : > { %v675_v54 = vpop.xlane.xlu0 %674 }
 0x26a   : > { %v676_v55 = vsub.f32 %v672_v37, %v675_v54 }
 0x26c   : > { %v677_v56 = vmul.f32 1.442695, %v676_v55 }
 0x26e   : > { %1733 = vpow2.f32 %v677_v56 }
 0x278   : > { %v1734_v57 = vpop.eup %1733 }
 0x279   : > { %v679_v58 = vsel %vm594_vm2, %v1734_v57, 0.0 }
 0x285   : > { %680 = vadd.xlane.f32.xlu1 %v679_v58 }
 0x2dd   : > { %v843_v59 = vpop.xlane.xlu1 %842 }
 0x2de   : > { %v844_v60 = vsub.f32 %v840_v42, %v843_v59 }
 0x2e0   : > { %v845_v61 = vmul.f32 1.442695, %v844_v60 }
 0x2e1   : > { %v686_v62 = vpop.permute.xlu1 %685  ;;  %v1012_v63 = vpop.xlane.xlu0 %1011 }
 0x2e2   : > { %1735 = vpow2.f32 %v845_v61  ;;  %v1013_v0 = vsub.f32 %v1009_v47, %v1012_v63  ;;  %1616 = vmatpush3.msra.mxu1 %v686_v62  ;;  %v1547_v47 = vld [vmem:[%s2181_s8] ss:$0 sm:$0xff] }
 0x2e3   : > { %1625 = vmatprep.subr.mxu1 %v1832_v9 }
 0x2e4   : > { %v1014_v1 = vmul.f32 1.442695, %v1013_v0 }
 0x2e5   : > { %v1181_v2 = vpop.xlane.xlu0 %1180 }
 0x2e6   : > { %1737 = vpow2.f32 %v1014_v1  ;;  %v1182_v4 = vsub.f32 %v1178_v52, %v1181_v2 }
 0x2e8   : > { %v1183_v5 = vmul.f32 1.442695, %v1182_v4 }
 0x2ea   : > { %1739 = vpow2.f32 %v1183_v5 }
 0x2ec   : > { %v1736_v6 = vpop.eup %1735 }
 0x2ed   : > { %v847_v7 = vsel %vm594_vm2, %v1736_v6, 0.0 }
 0x2ee   : > { %848 = vadd.xlane.f32.xlu0 %v847_v7 }
 0x2f0   : > { %v1738_v8 = vpop.eup %1737 }
 0x2f1   : > { %v1016_v10 = vsel %vm594_vm2, %v1738_v8, 0.0 }
 0x2f2   : > { %1017 = vadd.xlane.f32.xlu1 %v1016_v10 }
 0x2f4   : > { %v1740_v11 = vpop.eup %1739 }
 0x2f5   : > { %v1185_v12 = vsel %vm594_vm2, %v1740_v11, 0.0 }
 0x2f6   : > { %1186 = vadd.xlane.f32.xlu0 %v1185_v12 }
 0x303   : > { %1023 = vrot.lane.b32.xlu1 %v2022_v19, %s1837_s22  ;;  %s2120_s22 = scalar_lea.sflag [#allocation5], %s2192_s25 }
 0x307   : > { %1192 = vrot.lane.b32.xlu1 %v2022_v19, %s1838_s23  ;;  %s1556_s23 = sshll.u32 %s1934_s29, 9  ;;  %s1843_s29 = smov [#allocation4]  }
 0x30c   : > { %854 = vrot.lane.b32.xlu0 %v2022_v19, %s1839_s24  ;;  %s1422_s24 = sshll.u32 %s2065_s15, 4  ;;  %s2116_s24 = int_to_ptr.vmem [resolvable:$true] %s1422_s24 }
 0x312   : > { %v681_v13 = vpop.xlane.xlu1 %680 }
 0x313   : > { %1741 = vrcp.f32 %v681_v13 }
 0x31d   : > { %v1742_v14 = vpop.eup %1741 }
 0x31e   : > { %v683_v16 = vmul.f32 %v1742_v14, %v1734_v57 }
 0x320   : > { %684 = vst.msk [vmem:[%s2065_s15] sm:$0xff] %vm594_vm2, %v683_v16  ;;  %1618 = vmatmul.mubr.msk.f32.vlgmr.msra.gmra.mrb[4].mxu1 %vm594_vm2, %v683_v16 }
 0x321   : > { %1627 = vmatprep.mubr.msk.f32.mxu1 %vm1831_vm0, %v1832_v9 }
 0x37b   : > { %v849_v17 = vpop.xlane.xlu0 %848 }
 0x37c   : > { %1743 = vrcp.f32 %v849_v17 }
 0x37f   : > { %v1018_v18 = vpop.xlane.xlu1 %1017 }
 0x380   : > { %1745 = vrcp.f32 %v1018_v18 }
 0x383   : > { %v1187_v19 = vpop.xlane.xlu0 %1186  ;;  %v1024_v22 = vpop.permute.xlu1 %1023 }
 0x384   : > { %1747 = vrcp.f32 %v1187_v19 }
 0x386   : > { %v1744_v20 = vpop.eup %1743 }
 0x387   : > { %v851_v21 = vmul.f32 %v1744_v20, %v1736_v6  ;;  %v855_v23 = vpop.permute.xlu0 %854  ;;  %v1193_v26 = vpop.permute.xlu1 %1192 }
 0x388   : > { %1626 = vmatpush3.msra.mxu1 %v855_v23 }
 0x389   : > { %1537 = vst.msk [vmem:[%s2065_s15 + $0x8] sm:$0xff] %vm594_vm2, %v851_v21  ;;  %1628 = vmatmul.mubr.msk.f32.vlgmr.msra.gmra.mrb[6].mxu1 %vm594_vm2, %v851_v21  ;;  %1635 = vmatprep.subr.mxu1 %v1832_v9 }
 0x38a   : > { %v1746_v24 = vpop.eup %1745  ;;  %1636 = vmatpush3.msra.mxu1 %v1024_v22  ;;  %1637 = vmatprep.mubr.msk.f32.mxu1 %vm1831_vm0, %v1832_v9 }
 0x38b   : > { %v1020_v25 = vmul.f32 %v1746_v24, %v1738_v8  ;;  %1645 = vmatprep.subr.mxu1 %v1832_v9 }
 0x38d   : > { %1541 = vst.msk [vmem:[%s2065_s15 + $0x10] sm:$0xff] %vm594_vm2, %v1020_v25  ;;  %1638 = vmatmul.mubr.msk.f32.vlgmr.msra.gmra.mrb[8].mxu1 %vm594_vm2, %v1020_v25 }
 0x38e   : > { %v1748_v27 = vpop.eup %1747  ;;  %1646 = vmatpush3.msra.mxu1 %v1193_v26  ;;  %1647 = vmatprep.mubr.msk.f32.mxu1 %vm1831_vm0, %v1832_v9  ;;  %v1287_v9 = vld [vmem:[%s2180_s7 + $0x10] sm:$0xff] }
 0x38f   : > { %v1189_v28 = vmul.f32 %v1748_v27, %v1740_v11  ;;  %v1677_v35 = vpack.c.bf16 %v1288_v34, %v1287_v9 }
 0x391   : > { %1545 = vst.msk [vmem:[%s2065_s15 + $0x18] sm:$0xff] %vm594_vm2, %v1189_v28  ;;  %1648 = vmatmul.mubr.msk.f32.vlgmr.msra.gmra.mrb[10].mxu1 %vm594_vm2, %v1189_v28  ;;  %1678 = vmatpush3.bf16.msra.mxu0 %v1677_v35  ;;  %s1767_s15 = sshll.u32 %s1843_s29, 4  ;;  %s1768_s15 = int_to_ptr.vmem [resolvable:$false] %s1767_s15 }
 0x392   : > { %s1769_s1 = scalar_lea.vmem %s1768_s15, 1024  ;;  %p1770_p5 = scmp.lt.s32.totalorder %s2116_s24, %s1768_s15 }
 0x3f3   : > { %v757_v29 = vpop.f32.mrb[4].mxu1 }
 0x3f4   : > { %v1619_v30 = vpop.f32.mrb[5].mxu1 }
 0x45c   : > { %v926_v36 = vpop.f32.mrb[6].mxu1 }
 0x45d   : > { %1269 = vrot.lane.b32.xlu0 %v926_v36, %s2187_s19  ;;  %v1629_v37 = vpop.f32.mrb[7].mxu1  ;;  %s1763_s19 = scalar_lea.vmem %s2116_s24, 512 }
 0x45e   : > { %p1764_p2 = scmp.ne.s32.totalorder %s2116_s24, %s1763_s19  ;;  %p1771_p6 = scmp.lt.s32.totalorder %s1769_s1, %s1763_s19 }
 0x460   : > { %v1095_v38 = vpop.f32.mrb[8].mxu1  ;;  %p1765_p3 = pnand %p1764_p2, %p1951_p10  ;;  %p1772_p7 = por %p1771_p6, %p1770_p5 }
 0x461   : > { %1273 = vrot.lane.b32.xlu1 %v1095_v38, %s1841_s20  ;;  %v1639_v39 = vpop.f32.mrb[9].mxu1 }
 0x462   : > { %p1766_p4 = pneg %p1765_p3 }
 0x464   : > { %v1264_v3 = vpop.f32.mrb[10].mxu1  ;;  %p1773_p8 = pnand %p1772_p7, %p1766_p4 }
 0x465   : > { %1277 = vrot.lane.b32.xlu0 %v1264_v3, %s1842_s21  ;;  %v1649_v40 = vpop.f32.mrb[11].mxu1  ;;  %s2114_s21 = scalar_lea.hbm %s2185_s12, %s1556_s23 }
 0x4cf   : > { %v1270_v41 = vpop.permute.xlu0 %1269 }
 0x4d0   : > { %v1280_v43 = vsel %vm594_vm2, %v757_v29, %v1270_v41 }
 0x4d3   : > { %v1274_v42 = vpop.permute.xlu1 %1273 }
 0x4d4   : > { %v1282_v44 = vsel %vm1281_vm4, %v1280_v43, %v1274_v42 }
 0x4d7   : > { %v1278_v45 = vpop.permute.xlu0 %1277 }
 0x4d8   : > { %v1284_v46 = vsel %vm1283_vm5, %v1282_v44, %v1278_v45 }
 0x4d9   : > { %1659 = vmatmul.mubr.msk.f32.vlgmr.msra.gmra.mrb[8].mxu0 %vm430_vm1, %v1284_v46 }
 0x5ac   : > { %v1365_v48 = vpop.f32.mrb[8].mxu0 }
 0x5ad   : > { %v1366_v49 = vadd.f32 %v1547_v47, %v1365_v48  ;;  %v1660_v50 = vpop.f32.mrb[9].mxu0 }
 0x5af   : > { %v1369_v51 = vadd.f32 %v1366_v49, %v2005_v15 }
 0x5b1   : > { %v1372_v52 = vsel %vm430_vm1, %v1369_v51, 0.0 }
 0x5b2   : > { %1373 = vadd.xlane.f32.xlu1 %v1372_v52 }
 0x63f   : > { %v1374_v53 = vpop.xlane.xlu1 %1373 }
 0x640   : > { %v1376_v54 = vmul.f32 0.03125, %v1374_v53 }
 0x642   : > { %v1377_v55 = vsub.f32 %v1369_v51, %v1376_v54 }
 0x644   : > { %v1378_v56 = vmul.f32 %v1377_v55, %v1377_v55 }
 0x646   : > { %v1379_v57 = vsel %vm430_vm1, %v1378_v56, 0.0 }
 0x647   : > { %1380 = vadd.xlane.f32.xlu0 %v1379_v57 }
 0x648   : > { %1776 = shalt.err (!%p1773_p8)
}
 0x649   : > { %s1777_s23 = scalar_lea.hbm %s2114_s21, 512  ;;  %s1781_s25 = scalar_lea.hbm %s2185_s12, 1024 }
 0x64a   : > { %p1778_p9 = scmp.ne.s32.totalorder %s2114_s21, %s1777_s23  ;;  %p1782_p0 = scmp.lt.u32.totalorder %s2114_s21, %s2185_s12 }
 0x64b   : > { %p1783_p1 = scmp.lt.u32.totalorder %s1781_s25, %s1777_s23  ;;  %p1785_p3 = scmp.lt.u32.totalorder %s1777_s23, %s2114_s21 }
 0x64c   : > { %p1779_p12 = pnand %p1778_p9, %p1951_p10 }
 0x64d   : > { %p1784_p2 = por %p1783_p1, %p1782_p0 }
 0x64e   : > { %p1780_p13 = pneg %p1779_p12 }
 0x64f   : > { %p1786_p4 = por %p1785_p3, %p1784_p2 }
 0x651   : > { %p1787_p5 = pnand %p1786_p4, %p1780_p13 }
 0x653   : > { %1790 = shalt.err (!%p1787_p5)
}
 0x654   : > { %s1844_s1 = smov 128   ;;  %s2193_s19 = smov 8   ;;  %v1549_v61 = vld [vmem:[%s2182_s9] ss:$0 sm:$0xff] }
 0x655   : > { %1679 = dma.vmem_to_hbm [thread:$0]  (%p1951_p10), %s2116_s24, 512, %s2114_s21, %s2120_s22, %s1844_s1, %s1844_s1, %s2193_s19  }
 0x656   : > { %v1550_v63 = vld [vmem:[%s2183_s10] ss:$0 sm:$0xff]  ;;  %s416_s15 = scalar_lea.vmem %s2184_s11, %s1995_s30 }
 0x6d4   : > { %v1381_v15 = vpop.xlane.xlu0 %1380 }
 0x6d5   : > { %v1382_v58 = vmul.f32 0.03125, %v1381_v15 }
 0x6d7   : > { %v1383_v59 = vadd.f32 1e-05, %v1382_v58 }
 0x6d9   : > { %1749 = vrsqrt.f32 %v1383_v59 }
 0x6e3   : > { %v1750_v60 = vpop.eup %1749 }
 0x6e4   : > { %v1385_v62 = vmul.f32 %v1750_v60, %v1377_v55 }
 0x6e6   : > { %v1392_v0 = vmul.f32 %v1549_v61, %v1385_v62 }
 0x6e8   : > { %v1399_v1 = vadd.f32 %v1550_v63, %v1392_v0 }
 0x6ea   : > { %1400 = vst.msk [vmem:[%s416_s15] sm:$0xff] %vm430_vm1, %v1399_v1 }
 0x6eb PF: > { %p1685_p10 = scmp.ge.s32.totalorder %s1827_s28, 2  ;;  %s1444_s24 = sand.u32 1, %s1815_s26  }
 0x6ec   : > { %s1445_s21 = scalar_lea.sflag [#allocation5], %s1444_s24 }
 0x6ed   : > { %p1682_p6 = pnand %p1685_p10, %p1955_p11 }
 0x6ef   : > { %1810 = dma.done.wait (!%p1682_p6), %s1445_s21, 512  }
 0x6f0   : > { %1812 = vsyncadd (!%p1682_p6), %s1445_s21, 4294966784  ;;  %p29_p7 = scmp.ge.s32.totalorder %s1938_s13, 4   ;;  %s2194_s26 = smov %s1819_s27 }
 0x6f1   : > { %s2195_s27 = smov %s1823_s0  ;;  %s2196_s0 = smov %s1949_s16 }
 0x6f2   : > { %s2197_s28 = smov %s1938_s13  ;;  %31 = sbr.rel (!%p29_p7) target bundleno = 18 (0x12), region = 113 }
 0x6f9   :  { %1450 = vsyncpa [#allocation5], 1 }
 0x6fa   :  { %1452 = vsyncpa [#allocation5 + $0x1], 1 }

// kernel: speech_transformer_forward.15
= control target key start
LH: loop header
LB: loop body
LE: loop exit
PB: predicated region body
PF: predicated region fallthrough
CT: control target
= control target key end

     0   :  { %vm28_vm0 = vcmask 261120   ;;  %s278_s0 = inlined_call_operand.vmem [shape: f32[16,32], index: 0, kind: input, shape index: {}]   ;;  %s279_s1 = inlined_call_operand.vmem [shape: f32[32,16], index: 1, kind: input, shape index: {}]   ;;  %s280_s2 = inlined_call_operand.vmem [shape: f32[1,16], index: 2, kind: input, shape index: {}]   ;;  %s281_s3 = inlined_call_operand.hbm [shape: f32[16,16], index: 3, kind: output, shape index: {}]  }
   0x1   :  { %v17_v0 = vld [vmem:[%s279_s1] sm:$0xff]  ;;  %v18_v1 = vld [vmem:[%s279_s1 + $0x8] sm:$0xff]  ;;  %v19_v2 = vld [vmem:[%s279_s1 + $0x10] sm:$0xff] }
   0x2   :  { %v173_v3 = vpack.c.bf16 %v18_v1, %v17_v0  ;;  %v20_v4 = vld [vmem:[%s279_s1 + $0x18] sm:$0xff]  ;;  %v15_v5 = vld [vmem:[%s278_s0] sm:$0xff] }
   0x3   :  { %v177_v6 = vpack.c.bf16 %v20_v4, %v19_v2  ;;  %170 = vmatprep.mubr.msk.f32.mxu0 %vm28_vm0, %v15_v5 }
   0x4   :  { %8 = vsyncpa [#allocation3], 0  ;;  %174 = vmatprep.subr.bf16.mxu0 %v173_v3  ;;  %v16_v7 = vld [vmem:[%s278_s0 + $0x8] sm:$0xff]  ;;  %v153_v8 = vld [vmem:[%s280_s2] ss:$0 sm:$0xff]  ;;  %vm110_vm1 = vcmask 130048  }
   0x5   :  { %176 = vmatpush3.bf16.msra.mxu0 %v173_v3  ;;  %s216_s0 = smov [#allocation2]  }
   0x6   :  { %178 = vmatprep.subr.bf16.mxu0 %v177_v6  ;;  %s142_s1 = sshll.u32 %s216_s0, 4  ;;  %s143_s1 = int_to_ptr.vmem [resolvable:$true] %s142_s1 }
   0x7   :  { %s192_s2 = scalar_lea.vmem %s143_s1, 256  ;;  %p197_p1 = scmp.lt.s32.totalorder %s143_s1, %s143_s1 }
   0x8   :  { %p193_p0 = scmp.ne.s32.totalorder %s143_s1, %s192_s2  ;;  %p198_p2 = scmp.lt.s32.totalorder %s192_s2, %s192_s2 }
   0x9   :  { %180 = vmatpush3.bf16.msra.mxu0 %v177_v6 }
   0xa   :  { %p199_p3 = por %p198_p2, %p197_p1 }
   0xc   :  { %171 = vmatmul.mubr.msk.f32.vlgmr.msra.gmra.mrb[0].mxu0 %vm28_vm0, %v16_v7  ;;  %p200_p4 = pnand %p199_p3, %p193_p0 }
  0xdf   :  { %v172_v9 = vpop.f32.mrb[0].mxu0 }
  0xe0   :  { %v101_v10 = vpop.f32.mrb[1].mxu0  ;;  %v107_v12 = vadd.f32 %v172_v9, %v153_v8 }
  0xe1   :  { %v102_v11 = vadd.f32 %v153_v8, %v101_v10 }
  0xe2   :  { %v114_v14 = vsel %vm110_vm1, %v107_v12, -inf }
  0xe3   :  { %v111_v13 = vsel %vm110_vm1, %v102_v11, -inf }
  0xe4   :  { %112 = vmax.xlane.f32.xlu0 %v111_v13 }
  0xe8   :  { %115 = vmax.xlane.f32.xlu0 %v114_v14 }
 0x171   :  { %v113_v15 = vpop.xlane.xlu0 %112 }
 0x172   :  { %v117_v16 = vsub.f32 %v102_v11, %v113_v15 }
 0x174   :  { %v119_v17 = vmul.f32 1.442695, %v117_v16 }
 0x175   :  { %v116_v18 = vpop.xlane.xlu0 %115 }
 0x176   :  { %184 = vpow2.f32 %v119_v17  ;;  %v118_v19 = vsub.f32 %v107_v12, %v116_v18 }
 0x178   :  { %v121_v20 = vmul.f32 1.442695, %v118_v19 }
 0x17a   :  { %186 = vpow2.f32 %v121_v20 }
 0x180   :  { %v185_v21 = vpop.eup %184 }
 0x181   :  { %v123_v22 = vsel %vm110_vm1, %v185_v21, 0.0 }
 0x182   :  { %124 = vadd.xlane.f32.xlu1 %v123_v22 }
 0x184   :  { %v187_v23 = vpop.eup %186 }
 0x185   :  { %v126_v24 = vsel %vm110_vm1, %v187_v23, 0.0 }
 0x186   :  { %127 = vadd.xlane.f32.xlu1 %v126_v24 }
 0x20f   :  { %v125_v25 = vpop.xlane.xlu1 %124 }
 0x210   :  { %188 = vlog2.f32 %v125_v25 }
 0x213   :  { %v128_v26 = vpop.xlane.xlu1 %127 }
 0x214   :  { %190 = vlog2.f32 %v128_v26 }
 0x21a   :  { %v189_v27 = vpop.eup %188 }
 0x21b   :  { %v130_v28 = vmul.f32 0.6931472, %v189_v27 }
 0x21d   :  { %v133_v29 = vsub.f32 %v117_v16, %v130_v28 }
 0x21e   :  { %v191_v30 = vpop.eup %190 }
 0x21f   :  { %135 = vst.msk [vmem:[#allocation2] sm:$0xff] %vm110_vm1, %v133_v29  ;;  %v132_v31 = vmul.f32 0.6931472, %v191_v30 }
 0x221   :  { %v134_v32 = vsub.f32 %v118_v19, %v132_v31 }
 0x223   :  { %136 = vst.msk [vmem:[#allocation2 + $0x8] sm:$0xff] %vm110_vm1, %v134_v32 }
 0x224   :  { %203 = shalt.err (!%p200_p4)
}
 0x225   :  { %s204_s28 = scalar_lea.hbm %s281_s3, 256 }
 0x226   :  { %p205_p5 = scmp.ne.s32.totalorder %s281_s3, %s204_s28  ;;  %p208_p6 = scmp.lt.u32.totalorder %s204_s28, %s281_s3 }
 0x228   :  { %p210_p7 = pnand %p208_p6, %p205_p5 }
 0x22a   :  { %213 = shalt.err (!%p210_p7)
}
 0x22b   :  { %s217_s6 = smov 128   ;;  %s218_s7 = smov 8  }
 0x22c   :  { %148 = dma.vmem_to_hbm [thread:$0]  %s143_s1, 256, %s281_s3, [#allocation3], %s217_s6, %s217_s6, %s218_s7  }
 0x22d   :  { %214 = dma.done.wait [#allocation3], 256  }
 0x22e   :  { %215 = vsyncadd [#allocation3], 4294967040 }
 0x22f   :  { %152 = vsyncpa [#allocation3], 1 }

</bundles_post_ra>
